<compile_context>
chip_gen: v7x
topology: tpu7x:2x2x1
jax: 0.10.0
libtpu: 0.0.40
codegen_flags: <defaults>
</compile_context>

<pallas_src>
import functools

import jax
import jax.numpy as jnp
from jax.experimental import pallas as pl
from jax.experimental.pallas import tpu as pltpu


def _vmem_spec():
    # Every operand here is at most a few KB -> keep whole arrays resident in VMEM.
    return pl.BlockSpec(memory_space=pltpu.MemorySpace.VMEM)


def _fused_rnn_kernel(x_ref, h0_ref, c0_ref,
                      ew1_ref, eb1_ref, ew2_ref, eb2_ref,
                      *rest, num_layers):
    """Fused forward: encoder MLP -> num_layers x LSTM -> decoder Linear.

    rest = [w_ih_t, w_hh_t, b] * num_layers + [dec_w_t, dec_b, o_ref, seq_scratch]

    Layouts:
      x_ref       (T*B, in_c)   time-major tokens, row = t*B + b
      h0/c0       (L, B, H)
      o_ref       (B, T*out_c)  batch-first; wrapper reshapes to (B, T, out_c)
      seq_scratch (T*B, H)      VMEM staging of a layer's output sequence
    """
    dw_ref, db_ref, o_ref, seq_ref = rest[3 * num_layers:]
    _, B, H = h0_ref.shape
    TB = x_ref.shape[0]
    T = TB // B
    out_c = dw_ref.shape[1]
    f32 = jnp.float32

    # ---- encoder: Linear -> ReLU -> Linear, applied to all T*B tokens in two matmuls ----
    hid = jnp.dot(x_ref[...], ew1_ref[...], preferred_element_type=f32) + eb1_ref[...]
    hid = jnp.maximum(hid, 0.0)
    seq = jnp.dot(hid, ew2_ref[...], preferred_element_type=f32) + eb2_ref[...]      # (T*B, H)

    # ---- LSTM stack (PyTorch gate order i, f, g, o; b = b_ih + b_hh pre-summed) ----
    for layer in range(num_layers):
        wih_ref = rest[3 * layer + 0]     # (H_in, 4H)
        whh_ref = rest[3 * layer + 1]     # (H,    4H)
        b_ref = rest[3 * layer + 2]       # (1,    4H)
        last = layer + 1 == num_layers

        # Hoisted input projection: one (T*B, H_in) @ (H_in, 4H) matmul per layer; the
        # serial recurrence below keeps only the h @ W_hh matmul on its critical path.
        zx = jnp.dot(seq, wih_ref[...], preferred_element_type=f32) + b_ref[...]     # (T*B, 4H)

        h = h0_ref[layer]                 # (B, H)
        c = c0_ref[layer]
        # Fully unrolled: T is small and known at trace time, so the scheduler can
        # overlap MXU / EUP / VPU work of adjacent steps.
        for t in range(T):
            z = zx[t * B:(t + 1) * B, :] + jnp.dot(
                h, whh_ref[...], preferred_element_type=f32)                         # (B, 4H)
            # 4H == 128 here, so the four gates share one vreg row of lanes; intra-vreg
            # lane slices are cheaper than issuing four per-gate matmuls on the serial
            # dependency chain.
            i = jax.nn.sigmoid(z[:, 0 * H:1 * H])
            f = jax.nn.sigmoid(z[:, 1 * H:2 * H])
            g = jnp.tanh(z[:, 2 * H:3 * H])
            o = jax.nn.sigmoid(z[:, 3 * H:4 * H])
            c = f * c + i * g
            h = o * jnp.tanh(c)
            if last:
                # Fused decoder: project this step's hidden state and drop it into its
                # lane window of the single batch-first output tile.
                y = jnp.dot(h, dw_ref[...], preferred_element_type=f32) + db_ref[...]
                o_ref[:, t * out_c:(t + 1) * out_c] = y
            else:
                seq_ref[t * B:(t + 1) * B, :] = h    # stage next layer's input in VMEM

        if not last:
            seq = seq_ref[...]

    # NOTE: h_T / c_T are intentionally not written back -- RNNModel.forward discards them.


def init_params(key, cfg):
    """Deterministic params in PyTorch layout, pre-transposed / pre-folded for the kernel."""
    in_c = cfg["in_channels"]
    mid = cfg["mid_channels"]
    out_c = cfg["out_channels"]
    nl = cfg["num_layers"]
    assert mid % 8 == 0, "hidden size should stay sublane-aligned for the gate slicing"

    def u(k, shape):
        return jax.random.uniform(k, shape, jnp.float32, -0.1, 0.1)

    keys = jax.random.split(key, 6 + 4 * nl)
    params = {
        # Stored transposed (activations @ W_t) with 2-D biases; done once here instead
        # of on every forward call.
        "enc_w1_t": u(keys[0], (mid, in_c)).T,
        "enc_b1": u(keys[1], (1, mid)),
        "enc_w2_t": u(keys[2], (mid, mid)).T,
        "enc_b2": u(keys[3], (1, mid)),
        "dec_w_t": u(keys[4], (out_c, mid)).T,
        "dec_b": u(keys[5], (1, out_c)),
        "lstm": [],
    }
    for layer in range(nl):
        kb = 6 + 4 * layer
        w_ih = u(keys[kb + 0], (4 * mid, mid))      # layer input size == mid for all layers
        w_hh = u(keys[kb + 1], (4 * mid, mid))
        b_ih = u(keys[kb + 2], (4 * mid,))
        b_hh = u(keys[kb + 3], (4 * mid,))
        params["lstm"].append({
            "w_ih_t": w_ih.T,                       # (mid, 4*mid)
            "w_hh_t": w_hh.T,                       # (mid, 4*mid)
            "b": (b_ih + b_hh).reshape(1, -1),      # LSTM biases pre-summed
        })
    return params


def rnn_model_forward(params, x, hidden):
    """Pallas equivalent of RNNModel.forward(x, hidden) with batch_first=True."""
    B, T, in_c = x.shape
    h0, c0 = hidden
    mid = params["enc_w1_t"].shape[1]
    out_c = params["dec_w_t"].shape[1]
    num_layers = len(params["lstm"])
    assert h0.shape == (num_layers, B, mid) and c0.shape == (num_layers, B, mid)

    # Only host-side data movement: a ~0.5 KB transpose of the raw input to a time-major
    # 2-D token matrix (row = t*B + b). All activations stay inside the kernel / VMEM.
    x_tm = jnp.transpose(x.astype(jnp.float32), (1, 0, 2)).reshape(T * B, in_c)

    args = [x_tm, h0.astype(jnp.float32), c0.astype(jnp.float32),
            params["enc_w1_t"], params["enc_b1"], params["enc_w2_t"], params["enc_b2"]]
    for lp in params["lstm"]:
        args += [lp["w_ih_t"], lp["w_hh_t"], lp["b"]]
    args += [params["dec_w_t"], params["dec_b"]]

    kernel = functools.partial(_fused_rnn_kernel, num_layers=num_layers)
    # TODO(synk): at production scale, add a "parallel" batch grid axis (uses v7x's second
    # TensorCore), switch matmuls to bf16 inputs with f32 accumulation, and re-check the
    # all-in-VMEM assumption against v7x's 64 MiB VMEM (tile the time axis if needed).
    out2d = pl.pallas_call(
        kernel,
        out_shape=jax.ShapeDtypeStruct((B, T * out_c), jnp.float32),
        in_specs=[_vmem_spec()] * len(args),
        out_specs=_vmem_spec(),
        scratch_shapes=[pltpu.VMEM((T * B, mid), jnp.float32)],
    )(*args)
    return out2d.reshape(B, T, out_c)


if __name__ == "__main__":
    cfg = {"in_channels": 4, "mid_channels": 32, "out_channels": 4, "num_layers": 2}
    B, T = 2, 8

    key = jax.random.PRNGKey(0)
    pkey, xkey = jax.random.split(key)
    params = init_params(pkey, cfg)

    x = jax.random.normal(xkey, (B, T, cfg["in_channels"]), dtype=jnp.float32)
    h0 = jnp.zeros((cfg["num_layers"], B, cfg["mid_channels"]), jnp.float32)
    c0 = jnp.zeros_like(h0)

    fwd = jax.jit(rnn_model_forward)
    out = fwd(params, x, (h0, c0))
    jax.block_until_ready(out)
    assert out.shape == (B, T, cfg["out_channels"]), out.shape
    print("KERNEL_OK")
</pallas_src>

<mosaic_0001>
module attributes {stable_mosaic.version = 11 : i64} {
  func.func @_fused_rnn_kernel(%arg0: memref<16x4xf32, #tpu.memory_space<vmem>>, %arg1: memref<2x2x32xf32, #tpu.memory_space<vmem>>, %arg2: memref<2x2x32xf32, #tpu.memory_space<vmem>>, %arg3: memref<4x32xf32, #tpu.memory_space<vmem>>, %arg4: memref<1x32xf32, #tpu.memory_space<vmem>>, %arg5: memref<32x32xf32, #tpu.memory_space<vmem>>, %arg6: memref<1x32xf32, #tpu.memory_space<vmem>>, %arg7: memref<32x128xf32, #tpu.memory_space<vmem>>, %arg8: memref<32x128xf32, #tpu.memory_space<vmem>>, %arg9: memref<1x128xf32, #tpu.memory_space<vmem>>, %arg10: memref<32x128xf32, #tpu.memory_space<vmem>>, %arg11: memref<32x128xf32, #tpu.memory_space<vmem>>, %arg12: memref<1x128xf32, #tpu.memory_space<vmem>>, %arg13: memref<32x4xf32, #tpu.memory_space<vmem>>, %arg14: memref<1x4xf32, #tpu.memory_space<vmem>>, %arg15: memref<2x32xf32, #tpu.memory_space<vmem>>, %arg16: memref<16x32xf32, #tpu.memory_space<vmem>>) attributes {dimension_semantics = [], scalar_prefetch = 0 : i64, scratch_operands = 1 : i64, tpu.core_type = #tpu.core_type<tc>} {
    %c0 = arith.constant 0 : index
    %c0_0 = arith.constant 0 : index
    %0 = vector.load %arg0[%c0, %c0_0] : memref<16x4xf32, #tpu.memory_space<vmem>>, vector<16x4xf32>
    %c0_1 = arith.constant 0 : index
    %c0_2 = arith.constant 0 : index
    %1 = vector.load %arg3[%c0_1, %c0_2] : memref<4x32xf32, #tpu.memory_space<vmem>>, vector<4x32xf32>
    %cst = arith.constant dense<0.000000e+00> : vector<16x32xf32>
    %2 = tpu.matmul %0, %1, %cst {dimension_numbers = #tpu.dot_dimension_numbers<[1], [0], [0], [1], [0, 0, 1, 1], [], []>} : vector<16x4xf32>, vector<4x32xf32>, vector<16x32xf32> -> vector<16x32xf32>
    %c0_3 = arith.constant 0 : index
    %c0_4 = arith.constant 0 : index
    %3 = vector.load %arg4[%c0_3, %c0_4] : memref<1x32xf32, #tpu.memory_space<vmem>>, vector<1x32xf32>
    %4 = vector.broadcast %3 : vector<1x32xf32> to vector<16x32xf32>
    %5 = arith.addf %2, %4 : vector<16x32xf32>
    %cst_5 = arith.constant 0.000000e+00 : f32
    %6 = vector.broadcast %cst_5 : f32 to vector<16x32xf32>
    %7 = arith.maximumf %5, %6 : vector<16x32xf32>
    %c0_6 = arith.constant 0 : index
    %c0_7 = arith.constant 0 : index
    %8 = vector.load %arg5[%c0_6, %c0_7] : memref<32x32xf32, #tpu.memory_space<vmem>>, vector<32x32xf32>
    %cst_8 = arith.constant dense<0.000000e+00> : vector<16x32xf32>
    %9 = tpu.matmul %7, %8, %cst_8 {dimension_numbers = #tpu.dot_dimension_numbers<[1], [0], [0], [1], [0, 0, 1, 1], [], []>} : vector<16x32xf32>, vector<32x32xf32>, vector<16x32xf32> -> vector<16x32xf32>
    %c0_9 = arith.constant 0 : index
    %c0_10 = arith.constant 0 : index
    %10 = vector.load %arg6[%c0_9, %c0_10] : memref<1x32xf32, #tpu.memory_space<vmem>>, vector<1x32xf32>
    %11 = vector.broadcast %10 : vector<1x32xf32> to vector<16x32xf32>
    %12 = arith.addf %9, %11 : vector<16x32xf32>
    %c0_11 = arith.constant 0 : index
    %c0_12 = arith.constant 0 : index
    %13 = vector.load %arg7[%c0_11, %c0_12] : memref<32x128xf32, #tpu.memory_space<vmem>>, vector<32x128xf32>
    %cst_13 = arith.constant dense<0.000000e+00> : vector<16x128xf32>
    %14 = tpu.matmul %12, %13, %cst_13 {dimension_numbers = #tpu.dot_dimension_numbers<[1], [0], [0], [1], [0, 0, 1, 1], [], []>} : vector<16x32xf32>, vector<32x128xf32>, vector<16x128xf32> -> vector<16x128xf32>
    %c0_14 = arith.constant 0 : index
    %c0_15 = arith.constant 0 : index
    %15 = vector.load %arg9[%c0_14, %c0_15] : memref<1x128xf32, #tpu.memory_space<vmem>>, vector<1x128xf32>
    %16 = vector.broadcast %15 : vector<1x128xf32> to vector<16x128xf32>
    %17 = arith.addf %14, %16 : vector<16x128xf32>
    %c0_16 = arith.constant 0 : index
    %c0_17 = arith.constant 0 : index
    %c0_18 = arith.constant 0 : index
    %18 = vector.load %arg1[%c0_16, %c0_17, %c0_18] : memref<2x2x32xf32, #tpu.memory_space<vmem>>, vector<1x2x32xf32>
    %19 = vector.shape_cast %18 : vector<1x2x32xf32> to vector<2x32xf32>
    %c0_19 = arith.constant 0 : index
    %c0_20 = arith.constant 0 : index
    %c0_21 = arith.constant 0 : index
    %20 = vector.load %arg2[%c0_19, %c0_20, %c0_21] : memref<2x2x32xf32, #tpu.memory_space<vmem>>, vector<1x2x32xf32>
    %21 = vector.shape_cast %20 : vector<1x2x32xf32> to vector<2x32xf32>
    %22 = vector.extract_strided_slice %17 {offsets = [0, 0], sizes = [2, 128], strides = [1, 1]} : vector<16x128xf32> to vector<2x128xf32>
    %c0_22 = arith.constant 0 : index
    %c0_23 = arith.constant 0 : index
    %23 = vector.load %arg8[%c0_22, %c0_23] : memref<32x128xf32, #tpu.memory_space<vmem>>, vector<32x128xf32>
    %cst_24 = arith.constant dense<0.000000e+00> : vector<2x128xf32>
    %24 = tpu.matmul %19, %23, %cst_24 {dimension_numbers = #tpu.dot_dimension_numbers<[1], [0], [0], [1], [0, 0, 1, 1], [], []>} : vector<2x32xf32>, vector<32x128xf32>, vector<2x128xf32> -> vector<2x128xf32>
    %25 = arith.addf %22, %24 : vector<2x128xf32>
    %26 = vector.extract_strided_slice %25 {offsets = [0, 0], sizes = [2, 32], strides = [1, 1]} : vector<2x128xf32> to vector<2x32xf32>
    %27 = arith.negf %26 : vector<2x32xf32>
    %28 = math.exp %27 : vector<2x32xf32>
    %cst_25 = arith.constant 1.000000e+00 : f32
    %29 = vector.broadcast %cst_25 : f32 to vector<2x32xf32>
    %30 = arith.addf %29, %28 : vector<2x32xf32>
    %31 = arith.divf %29, %30 : vector<2x32xf32>
    %32 = vector.extract_strided_slice %25 {offsets = [0, 32], sizes = [2, 32], strides = [1, 1]} : vector<2x128xf32> to vector<2x32xf32>
    %33 = arith.negf %32 : vector<2x32xf32>
    %34 = math.exp %33 : vector<2x32xf32>
    %cst_26 = arith.constant 1.000000e+00 : f32
    %35 = vector.broadcast %cst_26 : f32 to vector<2x32xf32>
    %36 = arith.addf %35, %34 : vector<2x32xf32>
    %37 = arith.divf %35, %36 : vector<2x32xf32>
    %38 = vector.extract_strided_slice %25 {offsets = [0, 64], sizes = [2, 32], strides = [1, 1]} : vector<2x128xf32> to vector<2x32xf32>
    %39 = math.tanh %38 : vector<2x32xf32>
    %40 = vector.extract_strided_slice %25 {offsets = [0, 96], sizes = [2, 32], strides = [1, 1]} : vector<2x128xf32> to vector<2x32xf32>
    %41 = arith.negf %40 : vector<2x32xf32>
    %42 = math.exp %41 : vector<2x32xf32>
    %cst_27 = arith.constant 1.000000e+00 : f32
    %43 = vector.broadcast %cst_27 : f32 to vector<2x32xf32>
    %44 = arith.addf %43, %42 : vector<2x32xf32>
    %45 = arith.divf %43, %44 : vector<2x32xf32>
    %46 = arith.mulf %37, %21 : vector<2x32xf32>
    %47 = arith.mulf %31, %39 : vector<2x32xf32>
    %48 = arith.addf %46, %47 : vector<2x32xf32>
    %49 = math.tanh %48 : vector<2x32xf32>
    %50 = arith.mulf %45, %49 : vector<2x32xf32>
    %c0_28 = arith.constant 0 : index
    %c0_29 = arith.constant 0 : index
    %51 = vector.load %arg16[%c0_28, %c0_29] : memref<16x32xf32, #tpu.memory_space<vmem>>, vector<2x32xf32>
    tpu.vector_store %arg16[%c0_28, %c0_29], %50 {strides = array<i32>} : memref<16x32xf32, #tpu.memory_space<vmem>>, vector<2x32xf32>,
    %52 = vector.extract_strided_slice %17 {offsets = [2, 0], sizes = [2, 128], strides = [1, 1]} : vector<16x128xf32> to vector<2x128xf32>
    %c0_30 = arith.constant 0 : index
    %c0_31 = arith.constant 0 : index
    %53 = vector.load %arg8[%c0_30, %c0_31] : memref<32x128xf32, #tpu.memory_space<vmem>>, vector<32x128xf32>
    %cst_32 = arith.constant dense<0.000000e+00> : vector<2x128xf32>
    %54 = tpu.matmul %50, %53, %cst_32 {dimension_numbers = #tpu.dot_dimension_numbers<[1], [0], [0], [1], [0, 0, 1, 1], [], []>} : vector<2x32xf32>, vector<32x128xf32>, vector<2x128xf32> -> vector<2x128xf32>
    %55 = arith.addf %52, %54 : vector<2x128xf32>
    %56 = vector.extract_strided_slice %55 {offsets = [0, 0], sizes = [2, 32], strides = [1, 1]} : vector<2x128xf32> to vector<2x32xf32>
    %57 = arith.negf %56 : vector<2x32xf32>
    %58 = math.exp %57 : vector<2x32xf32>
    %cst_33 = arith.constant 1.000000e+00 : f32
    %59 = vector.broadcast %cst_33 : f32 to vector<2x32xf32>
    %60 = arith.addf %59, %58 : vector<2x32xf32>
    %61 = arith.divf %59, %60 : vector<2x32xf32>
    %62 = vector.extract_strided_slice %55 {offsets = [0, 32], sizes = [2, 32], strides = [1, 1]} : vector<2x128xf32> to vector<2x32xf32>
    %63 = arith.negf %62 : vector<2x32xf32>
    %64 = math.exp %63 : vector<2x32xf32>
    %cst_34 = arith.constant 1.000000e+00 : f32
    %65 = vector.broadcast %cst_34 : f32 to vector<2x32xf32>
    %66 = arith.addf %65, %64 : vector<2x32xf32>
    %67 = arith.divf %65, %66 : vector<2x32xf32>
    %68 = vector.extract_strided_slice %55 {offsets = [0, 64], sizes = [2, 32], strides = [1, 1]} : vector<2x128xf32> to vector<2x32xf32>
    %69 = math.tanh %68 : vector<2x32xf32>
    %70 = vector.extract_strided_slice %55 {offsets = [0, 96], sizes = [2, 32], strides = [1, 1]} : vector<2x128xf32> to vector<2x32xf32>
    %71 = arith.negf %70 : vector<2x32xf32>
    %72 = math.exp %71 : vector<2x32xf32>
    %cst_35 = arith.constant 1.000000e+00 : f32
    %73 = vector.broadcast %cst_35 : f32 to vector<2x32xf32>
    %74 = arith.addf %73, %72 : vector<2x32xf32>
    %75 = arith.divf %73, %74 : vector<2x32xf32>
    %76 = arith.mulf %67, %48 : vector<2x32xf32>
    %77 = arith.mulf %61, %69 : vector<2x32xf32>
    %78 = arith.addf %76, %77 : vector<2x32xf32>
    %79 = math.tanh %78 : vector<2x32xf32>
    %80 = arith.mulf %75, %79 : vector<2x32xf32>
    %c2 = arith.constant 2 : index
    %c0_36 = arith.constant 0 : index
    %81 = vector.load %arg16[%c2, %c0_36] : memref<16x32xf32, #tpu.memory_space<vmem>>, vector<2x32xf32>
    tpu.vector_store %arg16[%c2, %c0_36], %80 {strides = array<i32>} : memref<16x32xf32, #tpu.memory_space<vmem>>, vector<2x32xf32>,
    %82 = vector.extract_strided_slice %17 {offsets = [4, 0], sizes = [2, 128], strides = [1, 1]} : vector<16x128xf32> to vector<2x128xf32>
    %c0_37 = arith.constant 0 : index
    %c0_38 = arith.constant 0 : index
    %83 = vector.load %arg8[%c0_37, %c0_38] : memref<32x128xf32, #tpu.memory_space<vmem>>, vector<32x128xf32>
    %cst_39 = arith.constant dense<0.000000e+00> : vector<2x128xf32>
    %84 = tpu.matmul %80, %83, %cst_39 {dimension_numbers = #tpu.dot_dimension_numbers<[1], [0], [0], [1], [0, 0, 1, 1], [], []>} : vector<2x32xf32>, vector<32x128xf32>, vector<2x128xf32> -> vector<2x128xf32>
    %85 = arith.addf %82, %84 : vector<2x128xf32>
    %86 = vector.extract_strided_slice %85 {offsets = [0, 0], sizes = [2, 32], strides = [1, 1]} : vector<2x128xf32> to vector<2x32xf32>
    %87 = arith.negf %86 : vector<2x32xf32>
    %88 = math.exp %87 : vector<2x32xf32>
    %cst_40 = arith.constant 1.000000e+00 : f32
    %89 = vector.broadcast %cst_40 : f32 to vector<2x32xf32>
    %90 = arith.addf %89, %88 : vector<2x32xf32>
    %91 = arith.divf %89, %90 : vector<2x32xf32>
    %92 = vector.extract_strided_slice %85 {offsets = [0, 32], sizes = [2, 32], strides = [1, 1]} : vector<2x128xf32> to vector<2x32xf32>
    %93 = arith.negf %92 : vector<2x32xf32>
    %94 = math.exp %93 : vector<2x32xf32>
    %cst_41 = arith.constant 1.000000e+00 : f32
    %95 = vector.broadcast %cst_41 : f32 to vector<2x32xf32>
    %96 = arith.addf %95, %94 : vector<2x32xf32>
    %97 = arith.divf %95, %96 : vector<2x32xf32>
    %98 = vector.extract_strided_slice %85 {offsets = [0, 64], sizes = [2, 32], strides = [1, 1]} : vector<2x128xf32> to vector<2x32xf32>
    %99 = math.tanh %98 : vector<2x32xf32>
    %100 = vector.extract_strided_slice %85 {offsets = [0, 96], sizes = [2, 32], strides = [1, 1]} : vector<2x128xf32> to vector<2x32xf32>
    %101 = arith.negf %100 : vector<2x32xf32>
    %102 = math.exp %101 : vector<2x32xf32>
    %cst_42 = arith.constant 1.000000e+00 : f32
    %103 = vector.broadcast %cst_42 : f32 to vector<2x32xf32>
    %104 = arith.addf %103, %102 : vector<2x32xf32>
    %105 = arith.divf %103, %104 : vector<2x32xf32>
    %106 = arith.mulf %97, %78 : vector<2x32xf32>
    %107 = arith.mulf %91, %99 : vector<2x32xf32>
    %108 = arith.addf %106, %107 : vector<2x32xf32>
    %109 = math.tanh %108 : vector<2x32xf32>
    %110 = arith.mulf %105, %109 : vector<2x32xf32>
    %c4 = arith.constant 4 : index
    %c0_43 = arith.constant 0 : index
    %111 = vector.load %arg16[%c4, %c0_43] : memref<16x32xf32, #tpu.memory_space<vmem>>, vector<2x32xf32>
    tpu.vector_store %arg16[%c4, %c0_43], %110 {strides = array<i32>} : memref<16x32xf32, #tpu.memory_space<vmem>>, vector<2x32xf32>,
    %112 = vector.extract_strided_slice %17 {offsets = [6, 0], sizes = [2, 128], strides = [1, 1]} : vector<16x128xf32> to vector<2x128xf32>
    %c0_44 = arith.constant 0 : index
    %c0_45 = arith.constant 0 : index
    %113 = vector.load %arg8[%c0_44, %c0_45] : memref<32x128xf32, #tpu.memory_space<vmem>>, vector<32x128xf32>
    %cst_46 = arith.constant dense<0.000000e+00> : vector<2x128xf32>
    %114 = tpu.matmul %110, %113, %cst_46 {dimension_numbers = #tpu.dot_dimension_numbers<[1], [0], [0], [1], [0, 0, 1, 1], [], []>} : vector<2x32xf32>, vector<32x128xf32>, vector<2x128xf32> -> vector<2x128xf32>
    %115 = arith.addf %112, %114 : vector<2x128xf32>
    %116 = vector.extract_strided_slice %115 {offsets = [0, 0], sizes = [2, 32], strides = [1, 1]} : vector<2x128xf32> to vector<2x32xf32>
    %117 = arith.negf %116 : vector<2x32xf32>
    %118 = math.exp %117 : vector<2x32xf32>
    %cst_47 = arith.constant 1.000000e+00 : f32
    %119 = vector.broadcast %cst_47 : f32 to vector<2x32xf32>
    %120 = arith.addf %119, %118 : vector<2x32xf32>
    %121 = arith.divf %119, %120 : vector<2x32xf32>
    %122 = vector.extract_strided_slice %115 {offsets = [0, 32], sizes = [2, 32], strides = [1, 1]} : vector<2x128xf32> to vector<2x32xf32>
    %123 = arith.negf %122 : vector<2x32xf32>
    %124 = math.exp %123 : vector<2x32xf32>
    %cst_48 = arith.constant 1.000000e+00 : f32
    %125 = vector.broadcast %cst_48 : f32 to vector<2x32xf32>
    %126 = arith.addf %125, %124 : vector<2x32xf32>
    %127 = arith.divf %125, %126 : vector<2x32xf32>
    %128 = vector.extract_strided_slice %115 {offsets = [0, 64], sizes = [2, 32], strides = [1, 1]} : vector<2x128xf32> to vector<2x32xf32>
    %129 = math.tanh %128 : vector<2x32xf32>
    %130 = vector.extract_strided_slice %115 {offsets = [0, 96], sizes = [2, 32], strides = [1, 1]} : vector<2x128xf32> to vector<2x32xf32>
    %131 = arith.negf %130 : vector<2x32xf32>
    %132 = math.exp %131 : vector<2x32xf32>
    %cst_49 = arith.constant 1.000000e+00 : f32
    %133 = vector.broadcast %cst_49 : f32 to vector<2x32xf32>
    %134 = arith.addf %133, %132 : vector<2x32xf32>
    %135 = arith.divf %133, %134 : vector<2x32xf32>
    %136 = arith.mulf %127, %108 : vector<2x32xf32>
    %137 = arith.mulf %121, %129 : vector<2x32xf32>
    %138 = arith.addf %136, %137 : vector<2x32xf32>
    %139 = math.tanh %138 : vector<2x32xf32>
    %140 = arith.mulf %135, %139 : vector<2x32xf32>
    %c6 = arith.constant 6 : index
    %c0_50 = arith.constant 0 : index
    %141 = vector.load %arg16[%c6, %c0_50] : memref<16x32xf32, #tpu.memory_space<vmem>>, vector<2x32xf32>
    tpu.vector_store %arg16[%c6, %c0_50], %140 {strides = array<i32>} : memref<16x32xf32, #tpu.memory_space<vmem>>, vector<2x32xf32>,
    %142 = vector.extract_strided_slice %17 {offsets = [8, 0], sizes = [2, 128], strides = [1, 1]} : vector<16x128xf32> to vector<2x128xf32>
    %c0_51 = arith.constant 0 : index
    %c0_52 = arith.constant 0 : index
    %143 = vector.load %arg8[%c0_51, %c0_52] : memref<32x128xf32, #tpu.memory_space<vmem>>, vector<32x128xf32>
    %cst_53 = arith.constant dense<0.000000e+00> : vector<2x128xf32>
    %144 = tpu.matmul %140, %143, %cst_53 {dimension_numbers = #tpu.dot_dimension_numbers<[1], [0], [0], [1], [0, 0, 1, 1], [], []>} : vector<2x32xf32>, vector<32x128xf32>, vector<2x128xf32> -> vector<2x128xf32>
    %145 = arith.addf %142, %144 : vector<2x128xf32>
    %146 = vector.extract_strided_slice %145 {offsets = [0, 0], sizes = [2, 32], strides = [1, 1]} : vector<2x128xf32> to vector<2x32xf32>
    %147 = arith.negf %146 : vector<2x32xf32>
    %148 = math.exp %147 : vector<2x32xf32>
    %cst_54 = arith.constant 1.000000e+00 : f32
    %149 = vector.broadcast %cst_54 : f32 to vector<2x32xf32>
    %150 = arith.addf %149, %148 : vector<2x32xf32>
    %151 = arith.divf %149, %150 : vector<2x32xf32>
    %152 = vector.extract_strided_slice %145 {offsets = [0, 32], sizes = [2, 32], strides = [1, 1]} : vector<2x128xf32> to vector<2x32xf32>
    %153 = arith.negf %152 : vector<2x32xf32>
    %154 = math.exp %153 : vector<2x32xf32>
    %cst_55 = arith.constant 1.000000e+00 : f32
    %155 = vector.broadcast %cst_55 : f32 to vector<2x32xf32>
    %156 = arith.addf %155, %154 : vector<2x32xf32>
    %157 = arith.divf %155, %156 : vector<2x32xf32>
    %158 = vector.extract_strided_slice %145 {offsets = [0, 64], sizes = [2, 32], strides = [1, 1]} : vector<2x128xf32> to vector<2x32xf32>
    %159 = math.tanh %158 : vector<2x32xf32>
    %160 = vector.extract_strided_slice %145 {offsets = [0, 96], sizes = [2, 32], strides = [1, 1]} : vector<2x128xf32> to vector<2x32xf32>
    %161 = arith.negf %160 : vector<2x32xf32>
    %162 = math.exp %161 : vector<2x32xf32>
    %cst_56 = arith.constant 1.000000e+00 : f32
    %163 = vector.broadcast %cst_56 : f32 to vector<2x32xf32>
    %164 = arith.addf %163, %162 : vector<2x32xf32>
    %165 = arith.divf %163, %164 : vector<2x32xf32>
    %166 = arith.mulf %157, %138 : vector<2x32xf32>
    %167 = arith.mulf %151, %159 : vector<2x32xf32>
    %168 = arith.addf %166, %167 : vector<2x32xf32>
    %169 = math.tanh %168 : vector<2x32xf32>
    %170 = arith.mulf %165, %169 : vector<2x32xf32>
    %c8 = arith.constant 8 : index
    %c0_57 = arith.constant 0 : index
    %171 = vector.load %arg16[%c8, %c0_57] : memref<16x32xf32, #tpu.memory_space<vmem>>, vector<2x32xf32>
    tpu.vector_store %arg16[%c8, %c0_57], %170 {strides = array<i32>} : memref<16x32xf32, #tpu.memory_space<vmem>>, vector<2x32xf32>,
    %172 = vector.extract_strided_slice %17 {offsets = [10, 0], sizes = [2, 128], strides = [1, 1]} : vector<16x128xf32> to vector<2x128xf32>
    %c0_58 = arith.constant 0 : index
    %c0_59 = arith.constant 0 : index
    %173 = vector.load %arg8[%c0_58, %c0_59] : memref<32x128xf32, #tpu.memory_space<vmem>>, vector<32x128xf32>
    %cst_60 = arith.constant dense<0.000000e+00> : vector<2x128xf32>
    %174 = tpu.matmul %170, %173, %cst_60 {dimension_numbers = #tpu.dot_dimension_numbers<[1], [0], [0], [1], [0, 0, 1, 1], [], []>} : vector<2x32xf32>, vector<32x128xf32>, vector<2x128xf32> -> vector<2x128xf32>
    %175 = arith.addf %172, %174 : vector<2x128xf32>
    %176 = vector.extract_strided_slice %175 {offsets = [0, 0], sizes = [2, 32], strides = [1, 1]} : vector<2x128xf32> to vector<2x32xf32>
    %177 = arith.negf %176 : vector<2x32xf32>
    %178 = math.exp %177 : vector<2x32xf32>
    %cst_61 = arith.constant 1.000000e+00 : f32
    %179 = vector.broadcast %cst_61 : f32 to vector<2x32xf32>
    %180 = arith.addf %179, %178 : vector<2x32xf32>
    %181 = arith.divf %179, %180 : vector<2x32xf32>
    %182 = vector.extract_strided_slice %175 {offsets = [0, 32], sizes = [2, 32], strides = [1, 1]} : vector<2x128xf32> to vector<2x32xf32>
    %183 = arith.negf %182 : vector<2x32xf32>
    %184 = math.exp %183 : vector<2x32xf32>
    %cst_62 = arith.constant 1.000000e+00 : f32
    %185 = vector.broadcast %cst_62 : f32 to vector<2x32xf32>
    %186 = arith.addf %185, %184 : vector<2x32xf32>
    %187 = arith.divf %185, %186 : vector<2x32xf32>
    %188 = vector.extract_strided_slice %175 {offsets = [0, 64], sizes = [2, 32], strides = [1, 1]} : vector<2x128xf32> to vector<2x32xf32>
    %189 = math.tanh %188 : vector<2x32xf32>
    %190 = vector.extract_strided_slice %175 {offsets = [0, 96], sizes = [2, 32], strides = [1, 1]} : vector<2x128xf32> to vector<2x32xf32>
    %191 = arith.negf %190 : vector<2x32xf32>
    %192 = math.exp %191 : vector<2x32xf32>
    %cst_63 = arith.constant 1.000000e+00 : f32
    %193 = vector.broadcast %cst_63 : f32 to vector<2x32xf32>
    %194 = arith.addf %193, %192 : vector<2x32xf32>
    %195 = arith.divf %193, %194 : vector<2x32xf32>
    %196 = arith.mulf %187, %168 : vector<2x32xf32>
    %197 = arith.mulf %181, %189 : vector<2x32xf32>
    %198 = arith.addf %196, %197 : vector<2x32xf32>
    %199 = math.tanh %198 : vector<2x32xf32>
    %200 = arith.mulf %195, %199 : vector<2x32xf32>
    %c10 = arith.constant 10 : index
    %c0_64 = arith.constant 0 : index
    %201 = vector.load %arg16[%c10, %c0_64] : memref<16x32xf32, #tpu.memory_space<vmem>>, vector<2x32xf32>
    tpu.vector_store %arg16[%c10, %c0_64], %200 {strides = array<i32>} : memref<16x32xf32, #tpu.memory_space<vmem>>, vector<2x32xf32>,
    %202 = vector.extract_strided_slice %17 {offsets = [12, 0], sizes = [2, 128], strides = [1, 1]} : vector<16x128xf32> to vector<2x128xf32>
    %c0_65 = arith.constant 0 : index
    %c0_66 = arith.constant 0 : index
    %203 = vector.load %arg8[%c0_65, %c0_66] : memref<32x128xf32, #tpu.memory_space<vmem>>, vector<32x128xf32>
    %cst_67 = arith.constant dense<0.000000e+00> : vector<2x128xf32>
    %204 = tpu.matmul %200, %203, %cst_67 {dimension_numbers = #tpu.dot_dimension_numbers<[1], [0], [0], [1], [0, 0, 1, 1], [], []>} : vector<2x32xf32>, vector<32x128xf32>, vector<2x128xf32> -> vector<2x128xf32>
    %205 = arith.addf %202, %204 : vector<2x128xf32>
    %206 = vector.extract_strided_slice %205 {offsets = [0, 0], sizes = [2, 32], strides = [1, 1]} : vector<2x128xf32> to vector<2x32xf32>
    %207 = arith.negf %206 : vector<2x32xf32>
    %208 = math.exp %207 : vector<2x32xf32>
    %cst_68 = arith.constant 1.000000e+00 : f32
    %209 = vector.broadcast %cst_68 : f32 to vector<2x32xf32>
    %210 = arith.addf %209, %208 : vector<2x32xf32>
    %211 = arith.divf %209, %210 : vector<2x32xf32>
    %212 = vector.extract_strided_slice %205 {offsets = [0, 32], sizes = [2, 32], strides = [1, 1]} : vector<2x128xf32> to vector<2x32xf32>
    %213 = arith.negf %212 : vector<2x32xf32>
    %214 = math.exp %213 : vector<2x32xf32>
    %cst_69 = arith.constant 1.000000e+00 : f32
    %215 = vector.broadcast %cst_69 : f32 to vector<2x32xf32>
    %216 = arith.addf %215, %214 : vector<2x32xf32>
    %217 = arith.divf %215, %216 : vector<2x32xf32>
    %218 = vector.extract_strided_slice %205 {offsets = [0, 64], sizes = [2, 32], strides = [1, 1]} : vector<2x128xf32> to vector<2x32xf32>
    %219 = math.tanh %218 : vector<2x32xf32>
    %220 = vector.extract_strided_slice %205 {offsets = [0, 96], sizes = [2, 32], strides = [1, 1]} : vector<2x128xf32> to vector<2x32xf32>
    %221 = arith.negf %220 : vector<2x32xf32>
    %222 = math.exp %221 : vector<2x32xf32>
    %cst_70 = arith.constant 1.000000e+00 : f32
    %223 = vector.broadcast %cst_70 : f32 to vector<2x32xf32>
    %224 = arith.addf %223, %222 : vector<2x32xf32>
    %225 = arith.divf %223, %224 : vector<2x32xf32>
    %226 = arith.mulf %217, %198 : vector<2x32xf32>
    %227 = arith.mulf %211, %219 : vector<2x32xf32>
    %228 = arith.addf %226, %227 : vector<2x32xf32>
    %229 = math.tanh %228 : vector<2x32xf32>
    %230 = arith.mulf %225, %229 : vector<2x32xf32>
    %c12 = arith.constant 12 : index
    %c0_71 = arith.constant 0 : index
    %231 = vector.load %arg16[%c12, %c0_71] : memref<16x32xf32, #tpu.memory_space<vmem>>, vector<2x32xf32>
    tpu.vector_store %arg16[%c12, %c0_71], %230 {strides = array<i32>} : memref<16x32xf32, #tpu.memory_space<vmem>>, vector<2x32xf32>,
    %232 = vector.extract_strided_slice %17 {offsets = [14, 0], sizes = [2, 128], strides = [1, 1]} : vector<16x128xf32> to vector<2x128xf32>
    %c0_72 = arith.constant 0 : index
    %c0_73 = arith.constant 0 : index
    %233 = vector.load %arg8[%c0_72, %c0_73] : memref<32x128xf32, #tpu.memory_space<vmem>>, vector<32x128xf32>
    %cst_74 = arith.constant dense<0.000000e+00> : vector<2x128xf32>
    %234 = tpu.matmul %230, %233, %cst_74 {dimension_numbers = #tpu.dot_dimension_numbers<[1], [0], [0], [1], [0, 0, 1, 1], [], []>} : vector<2x32xf32>, vector<32x128xf32>, vector<2x128xf32> -> vector<2x128xf32>
    %235 = arith.addf %232, %234 : vector<2x128xf32>
    %236 = vector.extract_strided_slice %235 {offsets = [0, 0], sizes = [2, 32], strides = [1, 1]} : vector<2x128xf32> to vector<2x32xf32>
    %237 = arith.negf %236 : vector<2x32xf32>
    %238 = math.exp %237 : vector<2x32xf32>
    %cst_75 = arith.constant 1.000000e+00 : f32
    %239 = vector.broadcast %cst_75 : f32 to vector<2x32xf32>
    %240 = arith.addf %239, %238 : vector<2x32xf32>
    %241 = arith.divf %239, %240 : vector<2x32xf32>
    %242 = vector.extract_strided_slice %235 {offsets = [0, 32], sizes = [2, 32], strides = [1, 1]} : vector<2x128xf32> to vector<2x32xf32>
    %243 = arith.negf %242 : vector<2x32xf32>
    %244 = math.exp %243 : vector<2x32xf32>
    %cst_76 = arith.constant 1.000000e+00 : f32
    %245 = vector.broadcast %cst_76 : f32 to vector<2x32xf32>
    %246 = arith.addf %245, %244 : vector<2x32xf32>
    %247 = arith.divf %245, %246 : vector<2x32xf32>
    %248 = vector.extract_strided_slice %235 {offsets = [0, 64], sizes = [2, 32], strides = [1, 1]} : vector<2x128xf32> to vector<2x32xf32>
    %249 = math.tanh %248 : vector<2x32xf32>
    %250 = vector.extract_strided_slice %235 {offsets = [0, 96], sizes = [2, 32], strides = [1, 1]} : vector<2x128xf32> to vector<2x32xf32>
    %251 = arith.negf %250 : vector<2x32xf32>
    %252 = math.exp %251 : vector<2x32xf32>
    %cst_77 = arith.constant 1.000000e+00 : f32
    %253 = vector.broadcast %cst_77 : f32 to vector<2x32xf32>
    %254 = arith.addf %253, %252 : vector<2x32xf32>
    %255 = arith.divf %253, %254 : vector<2x32xf32>
    %256 = arith.mulf %247, %228 : vector<2x32xf32>
    %257 = arith.mulf %241, %249 : vector<2x32xf32>
    %258 = arith.addf %256, %257 : vector<2x32xf32>
    %259 = math.tanh %258 : vector<2x32xf32>
    %260 = arith.mulf %255, %259 : vector<2x32xf32>
    %c14 = arith.constant 14 : index
    %c0_78 = arith.constant 0 : index
    %261 = vector.load %arg16[%c14, %c0_78] : memref<16x32xf32, #tpu.memory_space<vmem>>, vector<2x32xf32>
    tpu.vector_store %arg16[%c14, %c0_78], %260 {strides = array<i32>} : memref<16x32xf32, #tpu.memory_space<vmem>>, vector<2x32xf32>,
    %c0_79 = arith.constant 0 : index
    %c0_80 = arith.constant 0 : index
    %262 = vector.load %arg16[%c0_79, %c0_80] : memref<16x32xf32, #tpu.memory_space<vmem>>, vector<16x32xf32>
    %c0_81 = arith.constant 0 : index
    %c0_82 = arith.constant 0 : index
    %263 = vector.load %arg10[%c0_81, %c0_82] : memref<32x128xf32, #tpu.memory_space<vmem>>, vector<32x128xf32>
    %cst_83 = arith.constant dense<0.000000e+00> : vector<16x128xf32>
    %264 = tpu.matmul %262, %263, %cst_83 {dimension_numbers = #tpu.dot_dimension_numbers<[1], [0], [0], [1], [0, 0, 1, 1], [], []>} : vector<16x32xf32>, vector<32x128xf32>, vector<16x128xf32> -> vector<16x128xf32>
    %c0_84 = arith.constant 0 : index
    %c0_85 = arith.constant 0 : index
    %265 = vector.load %arg12[%c0_84, %c0_85] : memref<1x128xf32, #tpu.memory_space<vmem>>, vector<1x128xf32>
    %266 = vector.broadcast %265 : vector<1x128xf32> to vector<16x128xf32>
    %267 = arith.addf %264, %266 : vector<16x128xf32>
    %c1 = arith.constant 1 : index
    %c0_86 = arith.constant 0 : index
    %c0_87 = arith.constant 0 : index
    %268 = vector.load %arg1[%c1, %c0_86, %c0_87] : memref<2x2x32xf32, #tpu.memory_space<vmem>>, vector<1x2x32xf32>
    %269 = vector.shape_cast %268 : vector<1x2x32xf32> to vector<2x32xf32>
    %c1_88 = arith.constant 1 : index
    %c0_89 = arith.constant 0 : index
    %c0_90 = arith.constant 0 : index
    %270 = vector.load %arg2[%c1_88, %c0_89, %c0_90] : memref<2x2x32xf32, #tpu.memory_space<vmem>>, vector<1x2x32xf32>
    %271 = vector.shape_cast %270 : vector<1x2x32xf32> to vector<2x32xf32>
    %272 = vector.extract_strided_slice %267 {offsets = [0, 0], sizes = [2, 128], strides = [1, 1]} : vector<16x128xf32> to vector<2x128xf32>
    %c0_91 = arith.constant 0 : index
    %c0_92 = arith.constant 0 : index
    %273 = vector.load %arg11[%c0_91, %c0_92] : memref<32x128xf32, #tpu.memory_space<vmem>>, vector<32x128xf32>
    %cst_93 = arith.constant dense<0.000000e+00> : vector<2x128xf32>
    %274 = tpu.matmul %269, %273, %cst_93 {dimension_numbers = #tpu.dot_dimension_numbers<[1], [0], [0], [1], [0, 0, 1, 1], [], []>} : vector<2x32xf32>, vector<32x128xf32>, vector<2x128xf32> -> vector<2x128xf32>
    %275 = arith.addf %272, %274 : vector<2x128xf32>
    %276 = vector.extract_strided_slice %275 {offsets = [0, 0], sizes = [2, 32], strides = [1, 1]} : vector<2x128xf32> to vector<2x32xf32>
    %277 = arith.negf %276 : vector<2x32xf32>
    %278 = math.exp %277 : vector<2x32xf32>
    %cst_94 = arith.constant 1.000000e+00 : f32
    %279 = vector.broadcast %cst_94 : f32 to vector<2x32xf32>
    %280 = arith.addf %279, %278 : vector<2x32xf32>
    %281 = arith.divf %279, %280 : vector<2x32xf32>
    %282 = vector.extract_strided_slice %275 {offsets = [0, 32], sizes = [2, 32], strides = [1, 1]} : vector<2x128xf32> to vector<2x32xf32>
    %283 = arith.negf %282 : vector<2x32xf32>
    %284 = math.exp %283 : vector<2x32xf32>
    %cst_95 = arith.constant 1.000000e+00 : f32
    %285 = vector.broadcast %cst_95 : f32 to vector<2x32xf32>
    %286 = arith.addf %285, %284 : vector<2x32xf32>
    %287 = arith.divf %285, %286 : vector<2x32xf32>
    %288 = vector.extract_strided_slice %275 {offsets = [0, 64], sizes = [2, 32], strides = [1, 1]} : vector<2x128xf32> to vector<2x32xf32>
    %289 = math.tanh %288 : vector<2x32xf32>
    %290 = vector.extract_strided_slice %275 {offsets = [0, 96], sizes = [2, 32], strides = [1, 1]} : vector<2x128xf32> to vector<2x32xf32>
    %291 = arith.negf %290 : vector<2x32xf32>
    %292 = math.exp %291 : vector<2x32xf32>
    %cst_96 = arith.constant 1.000000e+00 : f32
    %293 = vector.broadcast %cst_96 : f32 to vector<2x32xf32>
    %294 = arith.addf %293, %292 : vector<2x32xf32>
    %295 = arith.divf %293, %294 : vector<2x32xf32>
    %296 = arith.mulf %287, %271 : vector<2x32xf32>
    %297 = arith.mulf %281, %289 : vector<2x32xf32>
    %298 = arith.addf %296, %297 : vector<2x32xf32>
    %299 = math.tanh %298 : vector<2x32xf32>
    %300 = arith.mulf %295, %299 : vector<2x32xf32>
    %c0_97 = arith.constant 0 : index
    %c0_98 = arith.constant 0 : index
    %301 = vector.load %arg13[%c0_97, %c0_98] : memref<32x4xf32, #tpu.memory_space<vmem>>, vector<32x4xf32>
    %cst_99 = arith.constant dense<0.000000e+00> : vector<2x4xf32>
    %302 = tpu.matmul %300, %301, %cst_99 {dimension_numbers = #tpu.dot_dimension_numbers<[1], [0], [0], [1], [0, 0, 1, 1], [], []>} : vector<2x32xf32>, vector<32x4xf32>, vector<2x4xf32> -> vector<2x4xf32>
    %c0_100 = arith.constant 0 : index
    %c0_101 = arith.constant 0 : index
    %303 = vector.load %arg14[%c0_100, %c0_101] : memref<1x4xf32, #tpu.memory_space<vmem>>, vector<1x4xf32>
    %304 = vector.broadcast %303 : vector<1x4xf32> to vector<2x4xf32>
    %305 = arith.addf %302, %304 : vector<2x4xf32>
    %c0_102 = arith.constant 0 : index
    %c0_103 = arith.constant 0 : index
    %306 = vector.load %arg15[%c0_102, %c0_103] : memref<2x32xf32, #tpu.memory_space<vmem>>, vector<2x4xf32>
    tpu.vector_store %arg15[%c0_102, %c0_103], %305 {strides = array<i32>} : memref<2x32xf32, #tpu.memory_space<vmem>>, vector<2x4xf32>,
    %307 = vector.extract_strided_slice %267 {offsets = [2, 0], sizes = [2, 128], strides = [1, 1]} : vector<16x128xf32> to vector<2x128xf32>
    %c0_104 = arith.constant 0 : index
    %c0_105 = arith.constant 0 : index
    %308 = vector.load %arg11[%c0_104, %c0_105] : memref<32x128xf32, #tpu.memory_space<vmem>>, vector<32x128xf32>
    %cst_106 = arith.constant dense<0.000000e+00> : vector<2x128xf32>
    %309 = tpu.matmul %300, %308, %cst_106 {dimension_numbers = #tpu.dot_dimension_numbers<[1], [0], [0], [1], [0, 0, 1, 1], [], []>} : vector<2x32xf32>, vector<32x128xf32>, vector<2x128xf32> -> vector<2x128xf32>
    %310 = arith.addf %307, %309 : vector<2x128xf32>
    %311 = vector.extract_strided_slice %310 {offsets = [0, 0], sizes = [2, 32], strides = [1, 1]} : vector<2x128xf32> to vector<2x32xf32>
    %312 = arith.negf %311 : vector<2x32xf32>
    %313 = math.exp %312 : vector<2x32xf32>
    %cst_107 = arith.constant 1.000000e+00 : f32
    %314 = vector.broadcast %cst_107 : f32 to vector<2x32xf32>
    %315 = arith.addf %314, %313 : vector<2x32xf32>
    %316 = arith.divf %314, %315 : vector<2x32xf32>
    %317 = vector.extract_strided_slice %310 {offsets = [0, 32], sizes = [2, 32], strides = [1, 1]} : vector<2x128xf32> to vector<2x32xf32>
    %318 = arith.negf %317 : vector<2x32xf32>
    %319 = math.exp %318 : vector<2x32xf32>
    %cst_108 = arith.constant 1.000000e+00 : f32
    %320 = vector.broadcast %cst_108 : f32 to vector<2x32xf32>
    %321 = arith.addf %320, %319 : vector<2x32xf32>
    %322 = arith.divf %320, %321 : vector<2x32xf32>
    %323 = vector.extract_strided_slice %310 {offsets = [0, 64], sizes = [2, 32], strides = [1, 1]} : vector<2x128xf32> to vector<2x32xf32>
    %324 = math.tanh %323 : vector<2x32xf32>
    %325 = vector.extract_strided_slice %310 {offsets = [0, 96], sizes = [2, 32], strides = [1, 1]} : vector<2x128xf32> to vector<2x32xf32>
    %326 = arith.negf %325 : vector<2x32xf32>
    %327 = math.exp %326 : vector<2x32xf32>
    %cst_109 = arith.constant 1.000000e+00 : f32
    %328 = vector.broadcast %cst_109 : f32 to vector<2x32xf32>
    %329 = arith.addf %328, %327 : vector<2x32xf32>
    %330 = arith.divf %328, %329 : vector<2x32xf32>
    %331 = arith.mulf %322, %298 : vector<2x32xf32>
    %332 = arith.mulf %316, %324 : vector<2x32xf32>
    %333 = arith.addf %331, %332 : vector<2x32xf32>
    %334 = math.tanh %333 : vector<2x32xf32>
    %335 = arith.mulf %330, %334 : vector<2x32xf32>
    %c0_110 = arith.constant 0 : index
    %c0_111 = arith.constant 0 : index
    %336 = vector.load %arg13[%c0_110, %c0_111] : memref<32x4xf32, #tpu.memory_space<vmem>>, vector<32x4xf32>
    %cst_112 = arith.constant dense<0.000000e+00> : vector<2x4xf32>
    %337 = tpu.matmul %335, %336, %cst_112 {dimension_numbers = #tpu.dot_dimension_numbers<[1], [0], [0], [1], [0, 0, 1, 1], [], []>} : vector<2x32xf32>, vector<32x4xf32>, vector<2x4xf32> -> vector<2x4xf32>
    %c0_113 = arith.constant 0 : index
    %c0_114 = arith.constant 0 : index
    %338 = vector.load %arg14[%c0_113, %c0_114] : memref<1x4xf32, #tpu.memory_space<vmem>>, vector<1x4xf32>
    %339 = vector.broadcast %338 : vector<1x4xf32> to vector<2x4xf32>
    %340 = arith.addf %337, %339 : vector<2x4xf32>
    %c0_115 = arith.constant 0 : index
    %c4_116 = arith.constant 4 : index
    %341 = vector.load %arg15[%c0_115, %c4_116] : memref<2x32xf32, #tpu.memory_space<vmem>>, vector<2x4xf32>
    tpu.vector_store %arg15[%c0_115, %c4_116], %340 {strides = array<i32>} : memref<2x32xf32, #tpu.memory_space<vmem>>, vector<2x4xf32>,
    %342 = vector.extract_strided_slice %267 {offsets = [4, 0], sizes = [2, 128], strides = [1, 1]} : vector<16x128xf32> to vector<2x128xf32>
    %c0_117 = arith.constant 0 : index
    %c0_118 = arith.constant 0 : index
    %343 = vector.load %arg11[%c0_117, %c0_118] : memref<32x128xf32, #tpu.memory_space<vmem>>, vector<32x128xf32>
    %cst_119 = arith.constant dense<0.000000e+00> : vector<2x128xf32>
    %344 = tpu.matmul %335, %343, %cst_119 {dimension_numbers = #tpu.dot_dimension_numbers<[1], [0], [0], [1], [0, 0, 1, 1], [], []>} : vector<2x32xf32>, vector<32x128xf32>, vector<2x128xf32> -> vector<2x128xf32>
    %345 = arith.addf %342, %344 : vector<2x128xf32>
    %346 = vector.extract_strided_slice %345 {offsets = [0, 0], sizes = [2, 32], strides = [1, 1]} : vector<2x128xf32> to vector<2x32xf32>
    %347 = arith.negf %346 : vector<2x32xf32>
    %348 = math.exp %347 : vector<2x32xf32>
    %cst_120 = arith.constant 1.000000e+00 : f32
    %349 = vector.broadcast %cst_120 : f32 to vector<2x32xf32>
    %350 = arith.addf %349, %348 : vector<2x32xf32>
    %351 = arith.divf %349, %350 : vector<2x32xf32>
    %352 = vector.extract_strided_slice %345 {offsets = [0, 32], sizes = [2, 32], strides = [1, 1]} : vector<2x128xf32> to vector<2x32xf32>
    %353 = arith.negf %352 : vector<2x32xf32>
    %354 = math.exp %353 : vector<2x32xf32>
    %cst_121 = arith.constant 1.000000e+00 : f32
    %355 = vector.broadcast %cst_121 : f32 to vector<2x32xf32>
    %356 = arith.addf %355, %354 : vector<2x32xf32>
    %357 = arith.divf %355, %356 : vector<2x32xf32>
    %358 = vector.extract_strided_slice %345 {offsets = [0, 64], sizes = [2, 32], strides = [1, 1]} : vector<2x128xf32> to vector<2x32xf32>
    %359 = math.tanh %358 : vector<2x32xf32>
    %360 = vector.extract_strided_slice %345 {offsets = [0, 96], sizes = [2, 32], strides = [1, 1]} : vector<2x128xf32> to vector<2x32xf32>
    %361 = arith.negf %360 : vector<2x32xf32>
    %362 = math.exp %361 : vector<2x32xf32>
    %cst_122 = arith.constant 1.000000e+00 : f32
    %363 = vector.broadcast %cst_122 : f32 to vector<2x32xf32>
    %364 = arith.addf %363, %362 : vector<2x32xf32>
    %365 = arith.divf %363, %364 : vector<2x32xf32>
    %366 = arith.mulf %357, %333 : vector<2x32xf32>
    %367 = arith.mulf %351, %359 : vector<2x32xf32>
    %368 = arith.addf %366, %367 : vector<2x32xf32>
    %369 = math.tanh %368 : vector<2x32xf32>
    %370 = arith.mulf %365, %369 : vector<2x32xf32>
    %c0_123 = arith.constant 0 : index
    %c0_124 = arith.constant 0 : index
    %371 = vector.load %arg13[%c0_123, %c0_124] : memref<32x4xf32, #tpu.memory_space<vmem>>, vector<32x4xf32>
    %cst_125 = arith.constant dense<0.000000e+00> : vector<2x4xf32>
    %372 = tpu.matmul %370, %371, %cst_125 {dimension_numbers = #tpu.dot_dimension_numbers<[1], [0], [0], [1], [0, 0, 1, 1], [], []>} : vector<2x32xf32>, vector<32x4xf32>, vector<2x4xf32> -> vector<2x4xf32>
    %c0_126 = arith.constant 0 : index
    %c0_127 = arith.constant 0 : index
    %373 = vector.load %arg14[%c0_126, %c0_127] : memref<1x4xf32, #tpu.memory_space<vmem>>, vector<1x4xf32>
    %374 = vector.broadcast %373 : vector<1x4xf32> to vector<2x4xf32>
    %375 = arith.addf %372, %374 : vector<2x4xf32>
    %c0_128 = arith.constant 0 : index
    %c8_129 = arith.constant 8 : index
    %376 = vector.load %arg15[%c0_128, %c8_129] : memref<2x32xf32, #tpu.memory_space<vmem>>, vector<2x4xf32>
    tpu.vector_store %arg15[%c0_128, %c8_129], %375 {strides = array<i32>} : memref<2x32xf32, #tpu.memory_space<vmem>>, vector<2x4xf32>,
    %377 = vector.extract_strided_slice %267 {offsets = [6, 0], sizes = [2, 128], strides = [1, 1]} : vector<16x128xf32> to vector<2x128xf32>
    %c0_130 = arith.constant 0 : index
    %c0_131 = arith.constant 0 : index
    %378 = vector.load %arg11[%c0_130, %c0_131] : memref<32x128xf32, #tpu.memory_space<vmem>>, vector<32x128xf32>
    %cst_132 = arith.constant dense<0.000000e+00> : vector<2x128xf32>
    %379 = tpu.matmul %370, %378, %cst_132 {dimension_numbers = #tpu.dot_dimension_numbers<[1], [0], [0], [1], [0, 0, 1, 1], [], []>} : vector<2x32xf32>, vector<32x128xf32>, vector<2x128xf32> -> vector<2x128xf32>
    %380 = arith.addf %377, %379 : vector<2x128xf32>
    %381 = vector.extract_strided_slice %380 {offsets = [0, 0], sizes = [2, 32], strides = [1, 1]} : vector<2x128xf32> to vector<2x32xf32>
    %382 = arith.negf %381 : vector<2x32xf32>
    %383 = math.exp %382 : vector<2x32xf32>
    %cst_133 = arith.constant 1.000000e+00 : f32
    %384 = vector.broadcast %cst_133 : f32 to vector<2x32xf32>
    %385 = arith.addf %384, %383 : vector<2x32xf32>
    %386 = arith.divf %384, %385 : vector<2x32xf32>
    %387 = vector.extract_strided_slice %380 {offsets = [0, 32], sizes = [2, 32], strides = [1, 1]} : vector<2x128xf32> to vector<2x32xf32>
    %388 = arith.negf %387 : vector<2x32xf32>
    %389 = math.exp %388 : vector<2x32xf32>
    %cst_134 = arith.constant 1.000000e+00 : f32
    %390 = vector.broadcast %cst_134 : f32 to vector<2x32xf32>
    %391 = arith.addf %390, %389 : vector<2x32xf32>
    %392 = arith.divf %390, %391 : vector<2x32xf32>
    %393 = vector.extract_strided_slice %380 {offsets = [0, 64], sizes = [2, 32], strides = [1, 1]} : vector<2x128xf32> to vector<2x32xf32>
    %394 = math.tanh %393 : vector<2x32xf32>
    %395 = vector.extract_strided_slice %380 {offsets = [0, 96], sizes = [2, 32], strides = [1, 1]} : vector<2x128xf32> to vector<2x32xf32>
    %396 = arith.negf %395 : vector<2x32xf32>
    %397 = math.exp %396 : vector<2x32xf32>
    %cst_135 = arith.constant 1.000000e+00 : f32
    %398 = vector.broadcast %cst_135 : f32 to vector<2x32xf32>
    %399 = arith.addf %398, %397 : vector<2x32xf32>
    %400 = arith.divf %398, %399 : vector<2x32xf32>
    %401 = arith.mulf %392, %368 : vector<2x32xf32>
    %402 = arith.mulf %386, %394 : vector<2x32xf32>
    %403 = arith.addf %401, %402 : vector<2x32xf32>
    %404 = math.tanh %403 : vector<2x32xf32>
    %405 = arith.mulf %400, %404 : vector<2x32xf32>
    %c0_136 = arith.constant 0 : index
    %c0_137 = arith.constant 0 : index
    %406 = vector.load %arg13[%c0_136, %c0_137] : memref<32x4xf32, #tpu.memory_space<vmem>>, vector<32x4xf32>
    %cst_138 = arith.constant dense<0.000000e+00> : vector<2x4xf32>
    %407 = tpu.matmul %405, %406, %cst_138 {dimension_numbers = #tpu.dot_dimension_numbers<[1], [0], [0], [1], [0, 0, 1, 1], [], []>} : vector<2x32xf32>, vector<32x4xf32>, vector<2x4xf32> -> vector<2x4xf32>
    %c0_139 = arith.constant 0 : index
    %c0_140 = arith.constant 0 : index
    %408 = vector.load %arg14[%c0_139, %c0_140] : memref<1x4xf32, #tpu.memory_space<vmem>>, vector<1x4xf32>
    %409 = vector.broadcast %408 : vector<1x4xf32> to vector<2x4xf32>
    %410 = arith.addf %407, %409 : vector<2x4xf32>
    %c0_141 = arith.constant 0 : index
    %c12_142 = arith.constant 12 : index
    %411 = vector.load %arg15[%c0_141, %c12_142] : memref<2x32xf32, #tpu.memory_space<vmem>>, vector<2x4xf32>
    tpu.vector_store %arg15[%c0_141, %c12_142], %410 {strides = array<i32>} : memref<2x32xf32, #tpu.memory_space<vmem>>, vector<2x4xf32>,
    %412 = vector.extract_strided_slice %267 {offsets = [8, 0], sizes = [2, 128], strides = [1, 1]} : vector<16x128xf32> to vector<2x128xf32>
    %c0_143 = arith.constant 0 : index
    %c0_144 = arith.constant 0 : index
    %413 = vector.load %arg11[%c0_143, %c0_144] : memref<32x128xf32, #tpu.memory_space<vmem>>, vector<32x128xf32>
    %cst_145 = arith.constant dense<0.000000e+00> : vector<2x128xf32>
    %414 = tpu.matmul %405, %413, %cst_145 {dimension_numbers = #tpu.dot_dimension_numbers<[1], [0], [0], [1], [0, 0, 1, 1], [], []>} : vector<2x32xf32>, vector<32x128xf32>, vector<2x128xf32> -> vector<2x128xf32>
    %415 = arith.addf %412, %414 : vector<2x128xf32>
    %416 = vector.extract_strided_slice %415 {offsets = [0, 0], sizes = [2, 32], strides = [1, 1]} : vector<2x128xf32> to vector<2x32xf32>
    %417 = arith.negf %416 : vector<2x32xf32>
    %418 = math.exp %417 : vector<2x32xf32>
    %cst_146 = arith.constant 1.000000e+00 : f32
    %419 = vector.broadcast %cst_146 : f32 to vector<2x32xf32>
    %420 = arith.addf %419, %418 : vector<2x32xf32>
    %421 = arith.divf %419, %420 : vector<2x32xf32>
    %422 = vector.extract_strided_slice %415 {offsets = [0, 32], sizes = [2, 32], strides = [1, 1]} : vector<2x128xf32> to vector<2x32xf32>
    %423 = arith.negf %422 : vector<2x32xf32>
    %424 = math.exp %423 : vector<2x32xf32>
    %cst_147 = arith.constant 1.000000e+00 : f32
    %425 = vector.broadcast %cst_147 : f32 to vector<2x32xf32>
    %426 = arith.addf %425, %424 : vector<2x32xf32>
    %427 = arith.divf %425, %426 : vector<2x32xf32>
    %428 = vector.extract_strided_slice %415 {offsets = [0, 64], sizes = [2, 32], strides = [1, 1]} : vector<2x128xf32> to vector<2x32xf32>
    %429 = math.tanh %428 : vector<2x32xf32>
    %430 = vector.extract_strided_slice %415 {offsets = [0, 96], sizes = [2, 32], strides = [1, 1]} : vector<2x128xf32> to vector<2x32xf32>
    %431 = arith.negf %430 : vector<2x32xf32>
    %432 = math.exp %431 : vector<2x32xf32>
    %cst_148 = arith.constant 1.000000e+00 : f32
    %433 = vector.broadcast %cst_148 : f32 to vector<2x32xf32>
    %434 = arith.addf %433, %432 : vector<2x32xf32>
    %435 = arith.divf %433, %434 : vector<2x32xf32>
    %436 = arith.mulf %427, %403 : vector<2x32xf32>
    %437 = arith.mulf %421, %429 : vector<2x32xf32>
    %438 = arith.addf %436, %437 : vector<2x32xf32>
    %439 = math.tanh %438 : vector<2x32xf32>
    %440 = arith.mulf %435, %439 : vector<2x32xf32>
    %c0_149 = arith.constant 0 : index
    %c0_150 = arith.constant 0 : index
    %441 = vector.load %arg13[%c0_149, %c0_150] : memref<32x4xf32, #tpu.memory_space<vmem>>, vector<32x4xf32>
    %cst_151 = arith.constant dense<0.000000e+00> : vector<2x4xf32>
    %442 = tpu.matmul %440, %441, %cst_151 {dimension_numbers = #tpu.dot_dimension_numbers<[1], [0], [0], [1], [0, 0, 1, 1], [], []>} : vector<2x32xf32>, vector<32x4xf32>, vector<2x4xf32> -> vector<2x4xf32>
    %c0_152 = arith.constant 0 : index
    %c0_153 = arith.constant 0 : index
    %443 = vector.load %arg14[%c0_152, %c0_153] : memref<1x4xf32, #tpu.memory_space<vmem>>, vector<1x4xf32>
    %444 = vector.broadcast %443 : vector<1x4xf32> to vector<2x4xf32>
    %445 = arith.addf %442, %444 : vector<2x4xf32>
    %c0_154 = arith.constant 0 : index
    %c16 = arith.constant 16 : index
    %446 = vector.load %arg15[%c0_154, %c16] : memref<2x32xf32, #tpu.memory_space<vmem>>, vector<2x4xf32>
    tpu.vector_store %arg15[%c0_154, %c16], %445 {strides = array<i32>} : memref<2x32xf32, #tpu.memory_space<vmem>>, vector<2x4xf32>,
    %447 = vector.extract_strided_slice %267 {offsets = [10, 0], sizes = [2, 128], strides = [1, 1]} : vector<16x128xf32> to vector<2x128xf32>
    %c0_155 = arith.constant 0 : index
    %c0_156 = arith.constant 0 : index
    %448 = vector.load %arg11[%c0_155, %c0_156] : memref<32x128xf32, #tpu.memory_space<vmem>>, vector<32x128xf32>
    %cst_157 = arith.constant dense<0.000000e+00> : vector<2x128xf32>
    %449 = tpu.matmul %440, %448, %cst_157 {dimension_numbers = #tpu.dot_dimension_numbers<[1], [0], [0], [1], [0, 0, 1, 1], [], []>} : vector<2x32xf32>, vector<32x128xf32>, vector<2x128xf32> -> vector<2x128xf32>
    %450 = arith.addf %447, %449 : vector<2x128xf32>
    %451 = vector.extract_strided_slice %450 {offsets = [0, 0], sizes = [2, 32], strides = [1, 1]} : vector<2x128xf32> to vector<2x32xf32>
    %452 = arith.negf %451 : vector<2x32xf32>
    %453 = math.exp %452 : vector<2x32xf32>
    %cst_158 = arith.constant 1.000000e+00 : f32
    %454 = vector.broadcast %cst_158 : f32 to vector<2x32xf32>
    %455 = arith.addf %454, %453 : vector<2x32xf32>
    %456 = arith.divf %454, %455 : vector<2x32xf32>
    %457 = vector.extract_strided_slice %450 {offsets = [0, 32], sizes = [2, 32], strides = [1, 1]} : vector<2x128xf32> to vector<2x32xf32>
    %458 = arith.negf %457 : vector<2x32xf32>
    %459 = math.exp %458 : vector<2x32xf32>
    %cst_159 = arith.constant 1.000000e+00 : f32
    %460 = vector.broadcast %cst_159 : f32 to vector<2x32xf32>
    %461 = arith.addf %460, %459 : vector<2x32xf32>
    %462 = arith.divf %460, %461 : vector<2x32xf32>
    %463 = vector.extract_strided_slice %450 {offsets = [0, 64], sizes = [2, 32], strides = [1, 1]} : vector<2x128xf32> to vector<2x32xf32>
    %464 = math.tanh %463 : vector<2x32xf32>
    %465 = vector.extract_strided_slice %450 {offsets = [0, 96], sizes = [2, 32], strides = [1, 1]} : vector<2x128xf32> to vector<2x32xf32>
    %466 = arith.negf %465 : vector<2x32xf32>
    %467 = math.exp %466 : vector<2x32xf32>
    %cst_160 = arith.constant 1.000000e+00 : f32
    %468 = vector.broadcast %cst_160 : f32 to vector<2x32xf32>
    %469 = arith.addf %468, %467 : vector<2x32xf32>
    %470 = arith.divf %468, %469 : vector<2x32xf32>
    %471 = arith.mulf %462, %438 : vector<2x32xf32>
    %472 = arith.mulf %456, %464 : vector<2x32xf32>
    %473 = arith.addf %471, %472 : vector<2x32xf32>
    %474 = math.tanh %473 : vector<2x32xf32>
    %475 = arith.mulf %470, %474 : vector<2x32xf32>
    %c0_161 = arith.constant 0 : index
    %c0_162 = arith.constant 0 : index
    %476 = vector.load %arg13[%c0_161, %c0_162] : memref<32x4xf32, #tpu.memory_space<vmem>>, vector<32x4xf32>
    %cst_163 = arith.constant dense<0.000000e+00> : vector<2x4xf32>
    %477 = tpu.matmul %475, %476, %cst_163 {dimension_numbers = #tpu.dot_dimension_numbers<[1], [0], [0], [1], [0, 0, 1, 1], [], []>} : vector<2x32xf32>, vector<32x4xf32>, vector<2x4xf32> -> vector<2x4xf32>
    %c0_164 = arith.constant 0 : index
    %c0_165 = arith.constant 0 : index
    %478 = vector.load %arg14[%c0_164, %c0_165] : memref<1x4xf32, #tpu.memory_space<vmem>>, vector<1x4xf32>
    %479 = vector.broadcast %478 : vector<1x4xf32> to vector<2x4xf32>
    %480 = arith.addf %477, %479 : vector<2x4xf32>
    %c0_166 = arith.constant 0 : index
    %c20 = arith.constant 20 : index
    %481 = vector.load %arg15[%c0_166, %c20] : memref<2x32xf32, #tpu.memory_space<vmem>>, vector<2x4xf32>
    tpu.vector_store %arg15[%c0_166, %c20], %480 {strides = array<i32>} : memref<2x32xf32, #tpu.memory_space<vmem>>, vector<2x4xf32>,
    %482 = vector.extract_strided_slice %267 {offsets = [12, 0], sizes = [2, 128], strides = [1, 1]} : vector<16x128xf32> to vector<2x128xf32>
    %c0_167 = arith.constant 0 : index
    %c0_168 = arith.constant 0 : index
    %483 = vector.load %arg11[%c0_167, %c0_168] : memref<32x128xf32, #tpu.memory_space<vmem>>, vector<32x128xf32>
    %cst_169 = arith.constant dense<0.000000e+00> : vector<2x128xf32>
    %484 = tpu.matmul %475, %483, %cst_169 {dimension_numbers = #tpu.dot_dimension_numbers<[1], [0], [0], [1], [0, 0, 1, 1], [], []>} : vector<2x32xf32>, vector<32x128xf32>, vector<2x128xf32> -> vector<2x128xf32>
    %485 = arith.addf %482, %484 : vector<2x128xf32>
    %486 = vector.extract_strided_slice %485 {offsets = [0, 0], sizes = [2, 32], strides = [1, 1]} : vector<2x128xf32> to vector<2x32xf32>
    %487 = arith.negf %486 : vector<2x32xf32>
    %488 = math.exp %487 : vector<2x32xf32>
    %cst_170 = arith.constant 1.000000e+00 : f32
    %489 = vector.broadcast %cst_170 : f32 to vector<2x32xf32>
    %490 = arith.addf %489, %488 : vector<2x32xf32>
    %491 = arith.divf %489, %490 : vector<2x32xf32>
    %492 = vector.extract_strided_slice %485 {offsets = [0, 32], sizes = [2, 32], strides = [1, 1]} : vector<2x128xf32> to vector<2x32xf32>
    %493 = arith.negf %492 : vector<2x32xf32>
    %494 = math.exp %493 : vector<2x32xf32>
    %cst_171 = arith.constant 1.000000e+00 : f32
    %495 = vector.broadcast %cst_171 : f32 to vector<2x32xf32>
    %496 = arith.addf %495, %494 : vector<2x32xf32>
    %497 = arith.divf %495, %496 : vector<2x32xf32>
    %498 = vector.extract_strided_slice %485 {offsets = [0, 64], sizes = [2, 32], strides = [1, 1]} : vector<2x128xf32> to vector<2x32xf32>
    %499 = math.tanh %498 : vector<2x32xf32>
    %500 = vector.extract_strided_slice %485 {offsets = [0, 96], sizes = [2, 32], strides = [1, 1]} : vector<2x128xf32> to vector<2x32xf32>
    %501 = arith.negf %500 : vector<2x32xf32>
    %502 = math.exp %501 : vector<2x32xf32>
    %cst_172 = arith.constant 1.000000e+00 : f32
    %503 = vector.broadcast %cst_172 : f32 to vector<2x32xf32>
    %504 = arith.addf %503, %502 : vector<2x32xf32>
    %505 = arith.divf %503, %504 : vector<2x32xf32>
    %506 = arith.mulf %497, %473 : vector<2x32xf32>
    %507 = arith.mulf %491, %499 : vector<2x32xf32>
    %508 = arith.addf %506, %507 : vector<2x32xf32>
    %509 = math.tanh %508 : vector<2x32xf32>
    %510 = arith.mulf %505, %509 : vector<2x32xf32>
    %c0_173 = arith.constant 0 : index
    %c0_174 = arith.constant 0 : index
    %511 = vector.load %arg13[%c0_173, %c0_174] : memref<32x4xf32, #tpu.memory_space<vmem>>, vector<32x4xf32>
    %cst_175 = arith.constant dense<0.000000e+00> : vector<2x4xf32>
    %512 = tpu.matmul %510, %511, %cst_175 {dimension_numbers = #tpu.dot_dimension_numbers<[1], [0], [0], [1], [0, 0, 1, 1], [], []>} : vector<2x32xf32>, vector<32x4xf32>, vector<2x4xf32> -> vector<2x4xf32>
    %c0_176 = arith.constant 0 : index
    %c0_177 = arith.constant 0 : index
    %513 = vector.load %arg14[%c0_176, %c0_177] : memref<1x4xf32, #tpu.memory_space<vmem>>, vector<1x4xf32>
    %514 = vector.broadcast %513 : vector<1x4xf32> to vector<2x4xf32>
    %515 = arith.addf %512, %514 : vector<2x4xf32>
    %c0_178 = arith.constant 0 : index
    %c24 = arith.constant 24 : index
    %516 = vector.load %arg15[%c0_178, %c24] : memref<2x32xf32, #tpu.memory_space<vmem>>, vector<2x4xf32>
    tpu.vector_store %arg15[%c0_178, %c24], %515 {strides = array<i32>} : memref<2x32xf32, #tpu.memory_space<vmem>>, vector<2x4xf32>,
    %517 = vector.extract_strided_slice %267 {offsets = [14, 0], sizes = [2, 128], strides = [1, 1]} : vector<16x128xf32> to vector<2x128xf32>
    %c0_179 = arith.constant 0 : index
    %c0_180 = arith.constant 0 : index
    %518 = vector.load %arg11[%c0_179, %c0_180] : memref<32x128xf32, #tpu.memory_space<vmem>>, vector<32x128xf32>
    %cst_181 = arith.constant dense<0.000000e+00> : vector<2x128xf32>
    %519 = tpu.matmul %510, %518, %cst_181 {dimension_numbers = #tpu.dot_dimension_numbers<[1], [0], [0], [1], [0, 0, 1, 1], [], []>} : vector<2x32xf32>, vector<32x128xf32>, vector<2x128xf32> -> vector<2x128xf32>
    %520 = arith.addf %517, %519 : vector<2x128xf32>
    %521 = vector.extract_strided_slice %520 {offsets = [0, 0], sizes = [2, 32], strides = [1, 1]} : vector<2x128xf32> to vector<2x32xf32>
    %522 = arith.negf %521 : vector<2x32xf32>
    %523 = math.exp %522 : vector<2x32xf32>
    %cst_182 = arith.constant 1.000000e+00 : f32
    %524 = vector.broadcast %cst_182 : f32 to vector<2x32xf32>
    %525 = arith.addf %524, %523 : vector<2x32xf32>
    %526 = arith.divf %524, %525 : vector<2x32xf32>
    %527 = vector.extract_strided_slice %520 {offsets = [0, 32], sizes = [2, 32], strides = [1, 1]} : vector<2x128xf32> to vector<2x32xf32>
    %528 = arith.negf %527 : vector<2x32xf32>
    %529 = math.exp %528 : vector<2x32xf32>
    %cst_183 = arith.constant 1.000000e+00 : f32
    %530 = vector.broadcast %cst_183 : f32 to vector<2x32xf32>
    %531 = arith.addf %530, %529 : vector<2x32xf32>
    %532 = arith.divf %530, %531 : vector<2x32xf32>
    %533 = vector.extract_strided_slice %520 {offsets = [0, 64], sizes = [2, 32], strides = [1, 1]} : vector<2x128xf32> to vector<2x32xf32>
    %534 = math.tanh %533 : vector<2x32xf32>
    %535 = vector.extract_strided_slice %520 {offsets = [0, 96], sizes = [2, 32], strides = [1, 1]} : vector<2x128xf32> to vector<2x32xf32>
    %536 = arith.negf %535 : vector<2x32xf32>
    %537 = math.exp %536 : vector<2x32xf32>
    %cst_184 = arith.constant 1.000000e+00 : f32
    %538 = vector.broadcast %cst_184 : f32 to vector<2x32xf32>
    %539 = arith.addf %538, %537 : vector<2x32xf32>
    %540 = arith.divf %538, %539 : vector<2x32xf32>
    %541 = arith.mulf %532, %508 : vector<2x32xf32>
    %542 = arith.mulf %526, %534 : vector<2x32xf32>
    %543 = arith.addf %541, %542 : vector<2x32xf32>
    %544 = math.tanh %543 : vector<2x32xf32>
    %545 = arith.mulf %540, %544 : vector<2x32xf32>
    %c0_185 = arith.constant 0 : index
    %c0_186 = arith.constant 0 : index
    %546 = vector.load %arg13[%c0_185, %c0_186] : memref<32x4xf32, #tpu.memory_space<vmem>>, vector<32x4xf32>
    %cst_187 = arith.constant dense<0.000000e+00> : vector<2x4xf32>
    %547 = tpu.matmul %545, %546, %cst_187 {dimension_numbers = #tpu.dot_dimension_numbers<[1], [0], [0], [1], [0, 0, 1, 1], [], []>} : vector<2x32xf32>, vector<32x4xf32>, vector<2x4xf32> -> vector<2x4xf32>
    %c0_188 = arith.constant 0 : index
    %c0_189 = arith.constant 0 : index
    %548 = vector.load %arg14[%c0_188, %c0_189] : memref<1x4xf32, #tpu.memory_space<vmem>>, vector<1x4xf32>
    %549 = vector.broadcast %548 : vector<1x4xf32> to vector<2x4xf32>
    %550 = arith.addf %547, %549 : vector<2x4xf32>
    %c0_190 = arith.constant 0 : index
    %c28 = arith.constant 28 : index
    %551 = vector.load %arg15[%c0_190, %c28] : memref<2x32xf32, #tpu.memory_space<vmem>>, vector<2x4xf32>
    tpu.vector_store %arg15[%c0_190, %c28], %550 {strides = array<i32>} : memref<2x32xf32, #tpu.memory_space<vmem>>, vector<2x4xf32>,
    return
  }
}

</mosaic_0001>

<bundles_post_ra>
// kernel: rnn_model_forward.1
= control target key start
LH: loop header
LB: loop body
LE: loop exit
PB: predicated region body
PF: predicated region fallthrough
CT: control target
= control target key end

     0   :  { %20 = vsyncpa [#allocation4], 0  ;;  %s4607_s0 = inlined_call_operand.vmem [shape: f32[16,4], index: 0, kind: input, shape index: {}]   ;;  %s4608_s1 = inlined_call_operand.vmem [shape: f32[2,2,32], index: 1, kind: input, shape index: {}]   ;;  %s4609_s2 = inlined_call_operand.vmem [shape: f32[2,2,32], index: 2, kind: input, shape index: {}]   ;;  %s4610_s3 = inlined_call_operand.hbm [shape: f32[4,32], index: 3, kind: input, shape index: {}]   ;;  %s4611_s4 = inlined_call_operand.vmem [shape: f32[1,32], index: 4, kind: input, shape index: {}]   ;;  %s4612_s5 = inlined_call_operand.vmem [shape: f32[32,32], index: 5, kind: input, shape index: {}]   ;;  %s4613_s6 = inlined_call_operand.hbm [shape: f32[1,32], index: 6, kind: input, shape index: {}]   ;;  %s4614_s7 = inlined_call_operand.vmem [shape: f32[32,128], index: 7, kind: input, shape index: {}]   ;;  %s4615_s8 = inlined_call_operand.hbm [shape: f32[32,128], index: 8, kind: input, shape index: {}]   ;;  %s4616_s9 = inlined_call_operand.hbm [shape: f32[1,128], index: 9, kind: input, shape index: {}]   ;;  %s4617_s10 = inlined_call_operand.vmem [shape: f32[32,128], index: 10, kind: input, shape index: {}]   ;;  %s4618_s11 = inlined_call_operand.hbm [shape: f32[32,128], index: 11, kind: input, shape index: {}]   ;;  %s4619_s12 = inlined_call_operand.hbm [shape: f32[1,128], index: 12, kind: input, shape index: {}]   ;;  %s4620_s13 = inlined_call_operand.vmem [shape: f32[32,4], index: 13, kind: input, shape index: {}]   ;;  %s4621_s14 = inlined_call_operand.hbm [shape: f32[1,4], index: 14, kind: input, shape index: {}]   ;;  %s4622_s15 = inlined_call_operand.vmem [shape: f32[2,32], index: 15, kind: output, shape index: {}]  }
   0x1   :  { %21 = vsyncpa [#allocation6], 0 }
   0x2   :  { %22 = vsyncpa [#allocation9], 0 }
   0x3   :  { %23 = vsyncpa [#allocation12], 0  ;;  %s3997_s18 = smov [#allocation5]   ;;  %s3998_s20 = smov [#allocation8]  }
   0x4   :  { %s50_s19 = sshll.u32 %s3997_s18, 4  ;;  %s74_s21 = sshll.u32 %s3998_s20, 4  ;;  %s51_s19 = int_to_ptr.vmem [resolvable:$true] %s50_s19  ;;  %s75_s21 = int_to_ptr.vmem [resolvable:$true] %s74_s21 }
   0x5   :  { %s3835_s24 = scalar_lea.hbm %s4613_s6, 16 }
   0x6   :  { %p3836_p0 = scmp.ne.s32.totalorder %s4613_s6, %s3835_s24  ;;  %p3839_p1 = scmp.lt.u32.totalorder %s3835_s24, %s4613_s6 }
   0x8   :  { %p3841_p2 = pnand %p3839_p1, %p3836_p0 }
   0xa   :  { %3844 = shalt.err (!%p3841_p2)
}
   0xb   :  { %s3845_s29 = scalar_lea.vmem %s51_s19, 16  ;;  %s3849_s30 = scalar_lea.vmem %s51_s19, 32 }
   0xc   :  { %p3846_p3 = scmp.ne.s32.totalorder %s51_s19, %s3845_s29  ;;  %p3850_p4 = scmp.lt.s32.totalorder %s51_s19, %s51_s19 }
   0xd   :  { %p3851_p5 = scmp.lt.s32.totalorder %s3849_s30, %s3845_s29 }
   0xf   :  { %p3852_p6 = por %p3851_p5, %p3850_p4 }
  0x11   :  { %p3853_p7 = pnand %p3852_p6, %p3846_p3 }
  0x13   :  { %3856 = shalt.err (!%p3853_p7)
}
  0x14   :  { %53 = dma.hbm_to_vmem [thread:$0]  %s4613_s6, 16, %s51_s19, [#allocation6]  }
  0x15   :  { %s3857_s22 = scalar_lea.hbm %s4616_s9, 16 }
  0x16   :  { %p3858_p8 = scmp.ne.s32.totalorder %s4616_s9, %s3857_s22  ;;  %p3861_p9 = scmp.lt.u32.totalorder %s3857_s22, %s4616_s9 }
  0x18   :  { %p3863_p10 = pnand %p3861_p9, %p3858_p8 }
  0x1a   :  { %3866 = shalt.err (!%p3863_p10)
}
  0x1b   :  { %s3867_s27 = scalar_lea.vmem %s75_s21, 16  ;;  %s3871_s28 = scalar_lea.vmem %s75_s21, 32 }
  0x1c   :  { %p3868_p11 = scmp.ne.s32.totalorder %s75_s21, %s3867_s27  ;;  %p3872_p12 = scmp.lt.s32.totalorder %s75_s21, %s75_s21 }
  0x1d   :  { %p3873_p13 = scmp.lt.s32.totalorder %s3871_s28, %s3867_s27 }
  0x1f   :  { %p3874_p0 = por %p3873_p13, %p3872_p12 }
  0x21   :  { %p3875_p1 = pnand %p3874_p0, %p3868_p11 }
  0x23   :  { %3878 = shalt.err (!%p3875_p1)
}
  0x24   :  { %77 = dma.hbm_to_vmem [thread:$0]  %s4616_s9, 16, %s75_s21, [#allocation9]  }
  0x25   :  { %s3999_s29 = smov [#allocation11]   ;;  %s4000_s16 = smov [#allocation3]  }
  0x26   :  { %s98_s30 = sshll.u32 %s3999_s29, 4  ;;  %s36_s17 = sshll.u32 %s4000_s16, 4  ;;  %s99_s30 = int_to_ptr.vmem [resolvable:$true] %s98_s30  ;;  %s37_s17 = int_to_ptr.vmem [resolvable:$true] %s36_s17 }
  0x27   :  { %s3879_s22 = scalar_lea.hbm %s4619_s12, 16 }
  0x28   :  { %p3880_p2 = scmp.ne.s32.totalorder %s4619_s12, %s3879_s22  ;;  %p3883_p3 = scmp.lt.u32.totalorder %s3879_s22, %s4619_s12 }
  0x2a   :  { %p3885_p4 = pnand %p3883_p3, %p3880_p2 }
  0x2c   :  { %3888 = shalt.err (!%p3885_p4)
}
  0x2d   :  { %s3889_s9 = scalar_lea.vmem %s99_s30, 16  ;;  %s3893_s21 = scalar_lea.vmem %s99_s30, 32 }
  0x2e   :  { %p3890_p5 = scmp.ne.s32.totalorder %s99_s30, %s3889_s9  ;;  %p3894_p6 = scmp.lt.s32.totalorder %s99_s30, %s99_s30 }
  0x2f   :  { %p3895_p7 = scmp.lt.s32.totalorder %s3893_s21, %s3889_s9 }
  0x31   :  { %p3896_p8 = por %p3895_p7, %p3894_p6 }
  0x33   :  { %p3897_p9 = pnand %p3896_p8, %p3890_p5 }
  0x35   :  { %3900 = shalt.err (!%p3897_p9)
}
  0x36   :  { %101 = dma.hbm_to_vmem [thread:$0]  %s4619_s12, 16, %s99_s30, [#allocation12]  }
  0x37   :  { %s3901_s29 = scalar_lea.hbm %s4610_s3, 64 }
  0x38   :  { %p3902_p10 = scmp.ne.s32.totalorder %s4610_s3, %s3901_s29  ;;  %p3905_p11 = scmp.lt.u32.totalorder %s3901_s29, %s4610_s3 }
  0x3a   :  { %p3907_p12 = pnand %p3905_p11, %p3902_p10 }
  0x3c   :  { %3910 = shalt.err (!%p3907_p12)
}
  0x3d   :  { %s3911_s23 = scalar_lea.vmem %s37_s17, 64  ;;  %p3916_p0 = scmp.lt.s32.totalorder %s37_s17, %s37_s17 }
  0x3e   :  { %p3912_p13 = scmp.ne.s32.totalorder %s37_s17, %s3911_s23  ;;  %p3917_p1 = scmp.lt.s32.totalorder %s3911_s23, %s3911_s23 }
  0x40   :  { %p3918_p2 = por %p3917_p1, %p3916_p0 }
  0x42   :  { %p3919_p3 = pnand %p3918_p2, %p3912_p13 }
  0x44   :  { %3922 = shalt.err (!%p3919_p3)
}
  0x45   :  { %39 = dma.hbm_to_vmem [thread:$0]  %s4610_s3, 64, %s37_s17, [#allocation4]  }
  0x46   :  { %s4001_s24 = smov [#allocation7]   ;;  %s3923_s21 = scalar_lea.hbm %s4615_s8, 512 }
  0x47   :  { %s61_s25 = sshll.u32 %s4001_s24, 4  ;;  %p3924_p4 = scmp.ne.s32.totalorder %s4615_s8, %s3923_s21  ;;  %s62_s25 = int_to_ptr.vmem [resolvable:$true] %s61_s25 }
  0x48   :  { %p3927_p5 = scmp.lt.u32.totalorder %s3923_s21, %s4615_s8 }
  0x4a   :  { %p3929_p6 = pnand %p3927_p5, %p3924_p4 }
  0x4c   :  { %3932 = shalt.err (!%p3929_p6)
}
  0x4d   :  { %s3933_s29 = scalar_lea.vmem %s62_s25, 512  ;;  %p3938_p8 = scmp.lt.s32.totalorder %s62_s25, %s62_s25 }
  0x4e   :  { %p3934_p7 = scmp.ne.s32.totalorder %s62_s25, %s3933_s29  ;;  %p3939_p9 = scmp.lt.s32.totalorder %s3933_s29, %s3933_s29 }
  0x50   :  { %p3940_p10 = por %p3939_p9, %p3938_p8 }
  0x52   :  { %p3941_p11 = pnand %p3940_p10, %p3934_p7 }
  0x54   :  { %3944 = shalt.err (!%p3941_p11)
}
  0x55   :  { %s4002_s3 = smov 128   ;;  %s4003_s17 = smov 8  }
  0x56   :  { %67 = dma.hbm_to_vmem [thread:$0]  %s4615_s8, 512, %s62_s25, [#allocation6], %s4002_s3, %s4002_s3, %s4003_s17  }
  0x57   :  { %s4004_s20 = smov [#allocation10]   ;;  %s4005_s23 = smov [#allocation13]  }
  0x58   :  { %s85_s22 = sshll.u32 %s4004_s20, 4  ;;  %s110_s12 = sshll.u32 %s4005_s23, 4  ;;  %s86_s22 = int_to_ptr.vmem [resolvable:$true] %s85_s22  ;;  %s111_s12 = int_to_ptr.vmem [resolvable:$true] %s110_s12 }
  0x59   :  { %s3945_s26 = scalar_lea.hbm %s4618_s11, 512 }
  0x5a   :  { %p3946_p12 = scmp.ne.s32.totalorder %s4618_s11, %s3945_s26  ;;  %p3949_p13 = scmp.lt.u32.totalorder %s3945_s26, %s4618_s11 }
  0x5c   :  { %p3951_p0 = pnand %p3949_p13, %p3946_p12 }
  0x5e   :  { %3954 = shalt.err (!%p3951_p0)
}
  0x5f   :  { %s3955_s8 = scalar_lea.vmem %s86_s22, 512  ;;  %p3960_p2 = scmp.lt.s32.totalorder %s86_s22, %s86_s22 }
  0x60   :  { %p3956_p1 = scmp.ne.s32.totalorder %s86_s22, %s3955_s8  ;;  %p3961_p3 = scmp.lt.s32.totalorder %s3955_s8, %s3955_s8 }
  0x62   :  { %p3962_p4 = por %p3961_p3, %p3960_p2 }
  0x64   :  { %p3963_p5 = pnand %p3962_p4, %p3956_p1 }
  0x66   :  { %3966 = shalt.err (!%p3963_p5)
}
  0x67   :  { %91 = dma.hbm_to_vmem [thread:$0]  %s4618_s11, 512, %s86_s22, [#allocation9], %s4002_s3, %s4002_s3, %s4003_s17  }
  0x68   :  { %s3967_s16 = scalar_lea.hbm %s4621_s14, 16 }
  0x69   :  { %p3968_p6 = scmp.ne.s32.totalorder %s4621_s14, %s3967_s16  ;;  %p3971_p7 = scmp.lt.u32.totalorder %s3967_s16, %s4621_s14 }
  0x6b   :  { %p3973_p8 = pnand %p3971_p7, %p3968_p6 }
  0x6d   :  { %3976 = shalt.err (!%p3973_p8)
}
  0x6e   :  { %s3977_s24 = scalar_lea.vmem %s111_s12, 16  ;;  %s3981_s26 = scalar_lea.vmem %s111_s12, 32 }
  0x6f   :  { %p3978_p9 = scmp.ne.s32.totalorder %s111_s12, %s3977_s24  ;;  %p3982_p10 = scmp.lt.s32.totalorder %s111_s12, %s111_s12 }
  0x70   :  { %p3983_p11 = scmp.lt.s32.totalorder %s3981_s26, %s3977_s24 }
  0x72   :  { %p3984_p12 = por %p3983_p11, %p3982_p10 }
  0x74   :  { %p3985_p13 = pnand %p3984_p12, %p3978_p9 }
  0x76   :  { %3988 = shalt.err (!%p3985_p13)
}
  0x77   :  { %113 = dma.hbm_to_vmem [thread:$0]  %s4621_s14, 16, %s111_s12, [#allocation12]  }
  0x78   :  { %3989 = dma.done.wait [#allocation4], 64  }
  0x79   :  { %3990 = vsyncadd [#allocation4], 4294967232 }
  0x7a   :  { %3991 = dma.done.wait [#allocation6], 528  }
  0x7b   :  { %3992 = vsyncadd [#allocation6], 4294966768 }
  0x7c   :  { %3993 = dma.done.wait [#allocation9], 528  }
  0x7d   :  { %3994 = vsyncadd [#allocation9], 4294966768 }
  0x7e   :  { %3995 = dma.done.wait [#allocation12], 32  }
  0x7f   :  { %3996 = vsyncadd [#allocation12], 4294967264  ;;  %vm152_vm0 = vcmask 1043456   ;;  %vm145_vm1 = vcmask 31744   ;;  %v137_v0 = vld [vmem:[#allocation3] sm:$0xf] }
  0x80   :  { %v135_v1 = vld [vmem:[%s4607_s0] sm:$0xff]  ;;  %v136_v2 = vld [vmem:[%s4607_s0 + $0x8] sm:$0xff]  ;;  %3217 = vmatprep.subr.msk.mxu0 %vm152_vm0, %v137_v0  ;;  %v235_v6 = vld [vmem:[%s4612_s5 + $0x10] sm:$0xff]  ;;  %v4006_v12 = vmov 0.0|0.0   ;;  %vm244_vm2 = vcmask 261120   ;;  %vm4007_vm3 = vmmov 0  }
  0x81   :  { %3219 = vmatprep.mubr.msk.f32.mxu0 %vm145_vm1, %v135_v1  ;;  %v233_v3 = vld [vmem:[%s4612_s5] sm:$0xff]  ;;  %v234_v4 = vld [vmem:[%s4612_s5 + $0x8] sm:$0xff]  ;;  %3218 = vmatpush3.msk.msra.mxu0 %vm152_vm0, %v137_v0  ;;  %v236_v7 = vld [vmem:[%s4612_s5 + $0x18] sm:$0xff]  ;;  %v4008_v30 = vmov 0.0   ;;  %s4010_s21 = smov 32   ;;  %vm530_vm4 = vcmask 254976  }
  0x82   :  { %v3519_v5 = vpack.c.bf16 %v234_v4, %v233_v3  ;;  %3220 = vmatmul.mubr.msk.f32.vlgmr.msra.gmra.mrb[0].mxu0 %vm145_vm1, %v136_v2  ;;  %v3523_v8 = vpack.c.bf16 %v236_v7, %v235_v6  ;;  %v326_v9 = vld [vmem:[%s4614_s7] sm:$0xff]  ;;  %v327_v10 = vld [vmem:[%s4614_s7 + $0x8] sm:$0xff]  ;;  %v420_v20 = vld [vmem:[#allocation7] sm:$0xff]  ;;  %vm643_vm5 = vcmask 257026   ;;  %vm875_vm6 = vcmask 261126   ;;  %s4011_s26 = smov 4  }
  0x83   :  { %v3527_v11 = vpack.c.bf16 %v327_v10, %v326_v9  ;;  %v3013_v13 = vld [vmem:[%s4611_s4] ss:$0 sm:$0xff]  ;;  %v328_v23 = vld [vmem:[%s4614_s7 + $0x10] sm:$0xff]  ;;  %v329_v24 = vld [vmem:[%s4614_s7 + $0x18] sm:$0xff]  ;;  %s4009_s7 = smov 64   ;;  %vm759_vm7 = vcmask 259076  }
  0x84   :  { %3520 = vmatprep.subr.bf16.mxu1 %v3519_v5  ;;  %v421_v21 = vld [vmem:[#allocation7 + $0x8] sm:$0xff]  ;;  %v3531_v25 = vpack.c.bf16 %v329_v24, %v328_v23  ;;  %v422_v26 = vld [vmem:[#allocation7 + $0x10] sm:$0xff]  ;;  %v423_v27 = vld [vmem:[#allocation7 + $0x18] sm:$0xff]  ;;  %vm1621_vm8 = vcmask 25600   ;;  %s4012_s11 = smov 12   ;;  %s4013_s3 = smov 20  }
  0x85   :  { %3522 = vmatpush3.bf16.msra.mxu1 %v3519_v5  ;;  %3528 = vmatprep.subr.bf16.mxu0 %v3527_v11  ;;  %v4213_v22 = vpack.c.bf16 %v421_v21, %v420_v20  ;;  %v4223_v28 = vpack.c.bf16 %v423_v27, %v422_v26  ;;  %v418_v29 = vld [vmem:[%s4608_s1] sm:$0x3]  ;;  %v3017_v31 = vld [vmem:[#allocation5] ss:$0 sm:$0xff]  ;;  %v3020_v38 = vld [vmem:[#allocation8] ss:$0 sm:$0xff] }
  0x86   :  { %3524 = vmatprep.subr.bf16.mxu1 %v3523_v8  ;;  %3530 = vmatpush3.bf16.msra.mxu0 %v3527_v11  ;;  %v419_v45 = vld [vmem:[%s4609_s2] sm:$0x3]  ;;  %vm1819_vm9 = vcmask 58400   ;;  %s4014_s9 = smov 16   ;;  %s4015_s27 = smov 24   ;;  %vm2017_vm10 = vcmask 91200  }
  0x87   :  { %3532 = vmatprep.subr.bf16.mxu0 %v3531_v25  ;;  %vm2215_vm11 = vcmask 124000   ;;  %vm2409_vm12 = vcmask 156800   ;;  %vm2607_vm13 = vcmask 189600   ;;  %vm2805_vm14 = vcmask 222400   ;;  %s4016_s29 = smov 28  }
  0x88   :  { %vm3003_vm15 = vcmask 255200  }
  0x89   :  { %3526 = vmatpush3.bf16.msra.mxu1 %v3523_v8 }
  0x8a   :  { %3535 = vmatprep.subr.bf16.mxu1 %v4006_v12  ;;  %3534 = vmatpush3.bf16.msra.mxu0 %v3531_v25 }
  0x8b   :  { %3541 = vmatprep.subr.bf16.mxu0 %v4006_v12 }
 0x155   :  { %v3221_v14 = vpop.f32.mrb[0].mxu0 }
 0x156   :  { %v228_v15 = vadd.f32 %v3221_v14, %v3013_v13  ;;  %v222_v16 = vpop.f32.mrb[1].mxu0 }
 0x157   :  { %v223_v17 = vadd.f32 %v3013_v13, %v222_v16 }
 0x158   :  { %v232_v19 = vmax.f32 %v228_v15, 0.0 }
 0x159   :  { %v231_v18 = vmax.f32 %v223_v17, 0.0 }
 0x15b   :  { %3230 = vmatprep.mubr.msk.f32.mxu1 %vm244_vm2, %v231_v18 }
 0x15c   :  { %3231 = vmatmul.mubr.msk.f32.vlgmr.msra.gmra.mrb[0].mxu1 %vm244_vm2, %v232_v19 }
 0x15d   :  { %3537 = vmatpush3.bf16.msra.mxu1 %v4213_v22  ;;  %3252 = vmatprep.mubr.msk.f32.mxu1 %vm4007_vm3, %v4008_v30 }
 0x15e   :  { %3538 = vmatprep.subr.bf16.mxu1 %v4006_v12 }
 0x161   :  { %3540 = vmatpush3.bf16.msra.mxu1 %v4223_v28 }
 0x162   :  { %3547 = vmatprep.subr.bf16.mxu1 %v4006_v12 }
 0x164   :  { %3253 = vmatmul.mubr.msk.f32.vlgmr.msra.gmra.mrb[2].mxu1 %vm244_vm2, %v418_v29 }
 0x165   :  { %3549 = vmatpush3.bf16.msra.mxu1 %v4213_v22  ;;  %3274 = vmatprep.mubr.msk.f32.mxu1 %vm4007_vm3, %v4008_v30 }
 0x166   :  { %3550 = vmatprep.subr.bf16.mxu1 %v4006_v12 }
 0x169   :  { %3552 = vmatpush3.bf16.msra.mxu1 %v4223_v28 }
 0x16a   :  { %3559 = vmatprep.subr.bf16.mxu1 %v4006_v12 }
 0x22f   :  { %v3232_v32 = vpop.f32.mrb[0].mxu1 }
 0x230   :  { %v317_v33 = vpop.f32.mrb[1].mxu1  ;;  %v323_v35 = vadd.f32 %v3232_v32, %v3017_v31 }
 0x231   :  { %v318_v34 = vadd.f32 %v3017_v31, %v317_v33 }
 0x233   :  { %3241 = vmatprep.mubr.msk.f32.mxu0 %vm244_vm2, %v318_v34 }
 0x234   :  { %3242 = vmatmul.mubr.msk.f32.vlgmr.msra.gmra.mrb[2].mxu0 %vm244_vm2, %v323_v35 }
 0x235   :  { %3543 = vmatpush3.bf16.msra.mxu0 %v4213_v22  ;;  %3263 = vmatprep.mubr.msk.f32.mxu0 %vm4007_vm3, %v4008_v30 }
 0x236   :  { %3544 = vmatprep.subr.bf16.mxu0 %v4006_v12 }
 0x237   :  { %v493_v36 = vpop.f32.mrb[2].mxu1 }
 0x238   :  { %v3254_v37 = vpop.f32.mrb[3].mxu1 }
 0x239   :  { %3546 = vmatpush3.bf16.msra.mxu0 %v4223_v28 }
 0x23a   :  { %3553 = vmatprep.subr.bf16.mxu0 %v4006_v12 }
 0x307   :  { %v3243_v39 = vpop.f32.mrb[2].mxu0 }
 0x308   :  { %v4248_v40 = vadd.f32 %v3243_v39, %v3020_v38  ;;  %v409_v41 = vpop.f32.mrb[3].mxu0 }
 0x309   :  { %v4250_v42 = vadd.f32 %v3020_v38, %v409_v41 }
 0x30b   :  { %v497_v43 = vadd.f32 %v493_v36, %v4250_v42 }
 0x30d   :  { %3707 = vtanh.f32 %v497_v43  ;;  %v3024_v46 = vmul.f32 -1.442695, %v497_v43 }
 0x30f   :  { %3709 = vpow2.f32 %v3024_v46 }
 0x317   :  { %v3708_v44 = vpop.eup %3707 }
 0x318   :  { %511 = vrot.lane.b32.xlu0 %v3708_v44, %s4009_s7 }
 0x319   :  { %v3710_v47 = vpop.eup %3709 }
 0x31a   :  { %v501_v48 = vadd.f32 1.0, %v3710_v47 }
 0x31c   :  { %506 = vrot.lane.b32.xlu0 %v419_v45, %s4010_s21  ;;  %3711 = vrcp.f32 %v501_v48 }
 0x326   :  { %v3712_v49 = vpop.eup %3711 }
 0x38a   :  { %v512_v50 = vpop.permute.xlu0 %511 }
 0x38b   :  { %v514_v51 = vmul.f32 %v3712_v49, %v512_v50 }
 0x38d   :  { %516 = vrot.lane.b32.xlu1 %v514_v51, %s4010_s21 }
 0x38e   :  { %v507_v52 = vpop.permute.xlu0 %506 }
 0x38f   :  { %v509_v53 = vmul.f32 %v3712_v49, %v507_v52 }
 0x3ff   :  { %v517_v54 = vpop.permute.xlu1 %516 }
 0x400   :  { %v519_v55 = vadd.f32 %v517_v54, %v509_v53 }
 0x402   :  { %3713 = vtanh.f32 %v519_v55  ;;  %v620_v7 = vrot.slane %v519_v55, 6 }
 0x40c   :  { %v3714_v56 = vpop.eup %3713 }
 0x40d   :  { %522 = vrot.lane.b32.xlu1 %v3714_v56, %s4009_s7 }
 0x47f   :  { %v523_v57 = vpop.permute.xlu1 %522 }
 0x480   :  { %v525_v58 = vmul.f32 %v3712_v49, %v523_v57 }
 0x482   :  { %527 = vrot.lane.b32.xlu0 %v525_v58, %s4010_s21 }
 0x4f4   :  { %v528_v59 = vpop.permute.xlu0 %527 }
 0x4f5   :  { %531 = vst.msk [vmem:[#allocation2] sm:$0x3] %vm530_vm4, %v528_v59  ;;  %3264 = vmatmul.mubr.msk.f32.vlgmr.msra.gmra.mrb[4].mxu0 %vm244_vm2, %v528_v59 }
 0x4f6   :  { %3555 = vmatpush3.bf16.msra.mxu0 %v4213_v22  ;;  %3285 = vmatprep.mubr.msk.f32.mxu0 %vm4007_vm3, %v4008_v30 }
 0x4f7   :  { %3556 = vmatprep.subr.bf16.mxu0 %v4006_v12 }
 0x4fa   :  { %3558 = vmatpush3.bf16.msra.mxu0 %v4223_v28 }
 0x4fb   :  { %3565 = vmatprep.subr.bf16.mxu0 %v4006_v12 }
 0x5c8   :  { %v604_v60 = vpop.f32.mrb[4].mxu0 }
 0x5c9   :  { %v609_v61 = vrot.slane %v604_v60, 6  ;;  %v3265_v62 = vpop.f32.mrb[5].mxu0 }
 0x5cb   :  { %v611_v63 = vadd.f32 %v609_v61, %v4250_v42 }
 0x5cd   :  { %3715 = vtanh.f32 %v611_v63  ;;  %v3026_v1 = vmul.f32 -1.442695, %v611_v63 }
 0x5cf   :  { %3717 = vpow2.f32 %v3026_v1 }
 0x5d7   :  { %v3716_v0 = vpop.eup %3715 }
 0x5d8   :  { %624 = vrot.lane.b32.xlu1 %v3716_v0, %s4009_s7 }
 0x5d9   :  { %v3718_v2 = vpop.eup %3717 }
 0x5da   :  { %v615_v3 = vadd.f32 1.0, %v3718_v2 }
 0x5dc   :  { %3719 = vrcp.f32 %v615_v3 }
 0x5e6   :  { %v3720_v4 = vpop.eup %3719 }
 0x5e7   :  { %v622_v8 = vmul.f32 %v3720_v4, %v620_v7 }
 0x64a   :  { %v625_v5 = vpop.permute.xlu1 %624 }
 0x64b   :  { %v627_v6 = vmul.f32 %v3720_v4, %v625_v5 }
 0x64d   :  { %629 = vrot.lane.b32.xlu0 %v627_v6, %s4010_s21 }
 0x6bf   :  { %v630_v9 = vpop.permute.xlu0 %629 }
 0x6c0   :  { %v632_v10 = vadd.f32 %v630_v9, %v622_v8 }
 0x6c2   :  { %3721 = vtanh.f32 %v632_v10  ;;  %v736_v31 = vrot.slane %v632_v10, 6 }
 0x6cc   :  { %v3722_v11 = vpop.eup %3721 }
 0x6cd   :  { %635 = vrot.lane.b32.xlu1 %v3722_v11, %s4009_s7 }
 0x73f   :  { %v636_v13 = vpop.permute.xlu1 %635 }
 0x740   :  { %v4273_v14 = vmul.f32 %v3720_v4, %v636_v13 }
 0x742   :  { %v649_v15 = vrot.slane %v4273_v14, 2 }
 0x744   :  { %650 = vrot.lane.b32.xlu0 %v649_v15, %s4010_s21 }
 0x7b6   :  { %v651_v16 = vpop.permute.xlu0 %650 }
 0x7b7   :  { %3275 = vmatmul.mubr.msk.f32.vlgmr.msra.gmra.mrb[4].mxu1 %vm244_vm2, %v651_v16 }
 0x7b8   :  { %3561 = vmatpush3.bf16.msra.mxu1 %v4213_v22  ;;  %3296 = vmatprep.mubr.msk.f32.mxu1 %vm4007_vm3, %v4008_v30 }
 0x7b9   :  { %3562 = vmatprep.subr.bf16.mxu1 %v4006_v12 }
 0x7bc   :  { %3564 = vmatpush3.bf16.msra.mxu1 %v4223_v28 }
 0x7bd   :  { %3571 = vmatprep.subr.bf16.mxu1 %v4006_v12 }
 0x88a   :  { %v720_v17 = vpop.f32.mrb[4].mxu1 }
 0x88b   :  { %v725_v18 = vrot.slane %v720_v17, 4  ;;  %v3276_v19 = vpop.f32.mrb[5].mxu1 }
 0x88d   :  { %v727_v20 = vadd.f32 %v725_v18, %v4250_v42 }
 0x88f   :  { %3723 = vtanh.f32 %v727_v20  ;;  %v3028_v23 = vmul.f32 -1.442695, %v727_v20 }
 0x891   :  { %3725 = vpow2.f32 %v3028_v23 }
 0x899   :  { %v3724_v21 = vpop.eup %3723 }
 0x89a   :  { %740 = vrot.lane.b32.xlu1 %v3724_v21, %s4009_s7 }
 0x89b   :  { %v3726_v24 = vpop.eup %3725 }
 0x89c   :  { %v731_v25 = vadd.f32 1.0, %v3726_v24 }
 0x89e   :  { %3727 = vrcp.f32 %v731_v25 }
 0x8a8   :  { %v3728_v26 = vpop.eup %3727 }
 0x8a9   :  { %v738_v32 = vmul.f32 %v3728_v26, %v736_v31 }
 0x90c   :  { %v741_v27 = vpop.permute.xlu1 %740 }
 0x90d   :  { %v743_v29 = vmul.f32 %v3728_v26, %v741_v27 }
 0x90f   :  { %745 = vrot.lane.b32.xlu0 %v743_v29, %s4010_s21 }
 0x981   :  { %v746_v33 = vpop.permute.xlu0 %745 }
 0x982   :  { %v748_v34 = vadd.f32 %v746_v33, %v738_v32 }
 0x984   :  { %3729 = vtanh.f32 %v748_v34  ;;  %v852_v53 = vrot.slane %v748_v34, 6 }
 0x98e   :  { %v3730_v35 = vpop.eup %3729 }
 0x98f   :  { %751 = vrot.lane.b32.xlu1 %v3730_v35, %s4009_s7 }
 0xa01   :  { %v752_v36 = vpop.permute.xlu1 %751 }
 0xa02   :  { %v4288_v37 = vmul.f32 %v3728_v26, %v752_v36 }
 0xa04   :  { %v765_v38 = vrot.slane %v4288_v37, 4 }
 0xa06   :  { %766 = vrot.lane.b32.xlu0 %v765_v38, %s4010_s21 }
 0xa78   :  { %v767_v39 = vpop.permute.xlu0 %766 }
 0xa79   :  { %3286 = vmatmul.mubr.msk.f32.vlgmr.msra.gmra.mrb[6].mxu0 %vm244_vm2, %v767_v39 }
 0xa7a   :  { %3567 = vmatpush3.bf16.msra.mxu0 %v4213_v22  ;;  %3307 = vmatprep.mubr.msk.f32.mxu0 %vm4007_vm3, %v4008_v30 }
 0xa7b   :  { %3568 = vmatprep.subr.bf16.mxu0 %v4006_v12 }
 0xa7e   :  { %3570 = vmatpush3.bf16.msra.mxu0 %v4223_v28 }
 0xa7f   :  { %3577 = vmatprep.subr.bf16.mxu0 %v4006_v12 }
 0xb4c   :  { %v836_v41 = vpop.f32.mrb[6].mxu0 }
 0xb4d   :  { %v841_v43 = vrot.slane %v836_v41, 2  ;;  %v3287_v44 = vpop.f32.mrb[7].mxu0 }
 0xb4f   :  { %v843_v45 = vadd.f32 %v841_v43, %v4250_v42 }
 0xb51   :  { %3731 = vtanh.f32 %v843_v45  ;;  %v3030_v47 = vmul.f32 -1.442695, %v843_v45 }
 0xb53   :  { %3733 = vpow2.f32 %v3030_v47 }
 0xb5b   :  { %v3732_v46 = vpop.eup %3731 }
 0xb5c   :  { %856 = vrot.lane.b32.xlu1 %v3732_v46, %s4009_s7 }
 0xb5d   :  { %v3734_v48 = vpop.eup %3733 }
 0xb5e   :  { %v847_v49 = vadd.f32 1.0, %v3734_v48 }
 0xb60   :  { %3735 = vrcp.f32 %v847_v49 }
 0xb6a   :  { %v3736_v50 = vpop.eup %3735 }
 0xb6b   :  { %v854_v54 = vmul.f32 %v3736_v50, %v852_v53 }
 0xbce   :  { %v857_v51 = vpop.permute.xlu1 %856 }
 0xbcf   :  { %v859_v52 = vmul.f32 %v3736_v50, %v857_v51 }
 0xbd1   :  { %861 = vrot.lane.b32.xlu0 %v859_v52, %s4010_s21 }
 0xc43   :  { %v862_v55 = vpop.permute.xlu0 %861 }
 0xc44   :  { %v864_v56 = vadd.f32 %v862_v55, %v854_v54 }
 0xc46   :  { %3737 = vtanh.f32 %v864_v56  ;;  %v965_v7 = vrot.slane %v864_v56, 6 }
 0xc50   :  { %v3738_v42 = vpop.eup %3737 }
 0xc51   :  { %867 = vrot.lane.b32.xlu1 %v3738_v42, %s4009_s7 }
 0xcc3   :  { %v868_v57 = vpop.permute.xlu1 %867 }
 0xcc4   :  { %v4303_v58 = vmul.f32 %v3736_v50, %v868_v57 }
 0xcc6   :  { %v881_v59 = vrot.slane %v4303_v58, 6 }
 0xcc8   :  { %882 = vrot.lane.b32.xlu0 %v881_v59, %s4010_s21 }
 0xd3a   :  { %v883_v60 = vpop.permute.xlu0 %882 }
 0xd3b   :  { %3297 = vmatmul.mubr.msk.f32.vlgmr.msra.gmra.mrb[6].mxu1 %vm244_vm2, %v883_v60 }
 0xd3c   :  { %3573 = vmatpush3.bf16.msra.mxu1 %v4213_v22  ;;  %3318 = vmatprep.mubr.msk.f32.mxu1 %vm4007_vm3, %v4008_v30 }
 0xd3d   :  { %3574 = vmatprep.subr.bf16.mxu1 %v4006_v12 }
 0xd40   :  { %3576 = vmatpush3.bf16.msra.mxu1 %v4223_v28 }
 0xe0e   :  { %v952_v61 = vpop.f32.mrb[6].mxu1 }
 0xe0f   :  { %v956_v62 = vadd.f32 %v952_v61, %v4248_v40  ;;  %v3298_v63 = vpop.f32.mrb[7].mxu1 }
 0xe11   :  { %3739 = vtanh.f32 %v956_v62  ;;  %v3032_v1 = vmul.f32 -1.442695, %v956_v62 }
 0xe13   :  { %3741 = vpow2.f32 %v3032_v1 }
 0xe1b   :  { %v3740_v0 = vpop.eup %3739 }
 0xe1c   :  { %969 = vrot.lane.b32.xlu1 %v3740_v0, %s4009_s7 }
 0xe1d   :  { %v3742_v2 = vpop.eup %3741 }
 0xe1e   :  { %v960_v3 = vadd.f32 1.0, %v3742_v2 }
 0xe20   :  { %3743 = vrcp.f32 %v960_v3 }
 0xe2a   :  { %v3744_v4 = vpop.eup %3743 }
 0xe2b   :  { %v967_v8 = vmul.f32 %v3744_v4, %v965_v7 }
 0xe8e   :  { %v970_v5 = vpop.permute.xlu1 %969 }
 0xe8f   :  { %v972_v6 = vmul.f32 %v3744_v4, %v970_v5 }
 0xe91   :  { %974 = vrot.lane.b32.xlu0 %v972_v6, %s4010_s21 }
 0xf03   :  { %v975_v9 = vpop.permute.xlu0 %974 }
 0xf04   :  { %v977_v10 = vadd.f32 %v975_v9, %v967_v8 }
 0xf06   :  { %3745 = vtanh.f32 %v977_v10 }
 0xf10   :  { %v3746_v11 = vpop.eup %3745 }
 0xf11   :  { %980 = vrot.lane.b32.xlu1 %v3746_v11, %s4009_s7 }
 0xf83   :  { %v981_v13 = vpop.permute.xlu1 %980 }
 0xf84   :  { %v983_v15 = vmul.f32 %v3744_v4, %v981_v13 }
 0xf86   :  { %985 = vrot.lane.b32.xlu0 %v983_v15, %s4010_s21 }
 0xff8   :  { %v986_v16 = vpop.permute.xlu0 %985 }
 0xff9   :  { %988 = vst.msk [vmem:[#allocation2 + $0x8] sm:$0x3] %vm530_vm4, %v986_v16  ;;  %3308 = vmatmul.mubr.msk.f32.vlgmr.msra.gmra.mrb[8].mxu0 %vm244_vm2, %v986_v16  ;;  %v1334_v16 = vld [vmem:[%s4617_s10 + $0x8] sm:$0xff] }
 0xffa   :  { %3579 = vmatpush3.bf16.msra.mxu0 %v4213_v22  ;;  %3329 = vmatprep.mubr.msk.f32.mxu0 %vm4007_vm3, %v4008_v30 }
 0xffb   :  { %3580 = vmatprep.subr.bf16.mxu0 %v4006_v12 }
 0xffe   :  { %3582 = vmatpush3.bf16.msra.mxu0 %v4223_v28  ;;  %v1077_v28 = vrot.slane %v977_v10, 6 }
 0xfff   :  { %3591 = vmatprep.subr.bf16.mxu0 %v4006_v12 }
0x10cc   :  { %v1061_v17 = vpop.f32.mrb[8].mxu0 }
0x10cd   :  { %v1066_v18 = vrot.slane %v1061_v17, 6  ;;  %v3309_v19 = vpop.f32.mrb[9].mxu0 }
0x10ce   :  { %v1430_v19 = vld [vmem:[#allocation10 + $0x8] sm:$0xff] }
0x10cf   :  { %v1068_v20 = vadd.f32 %v1066_v18, %v4248_v40  ;;  %v1429_v18 = vld [vmem:[#allocation10] sm:$0xff] }
0x10d1   :  { %3747 = vtanh.f32 %v1068_v20  ;;  %v3034_v23 = vmul.f32 -1.442695, %v1068_v20  ;;  %v1335_v20 = vld [vmem:[%s4617_s10 + $0x10] sm:$0xff] }
0x10d3   :  { %3749 = vpow2.f32 %v3034_v23  ;;  %v1431_v23 = vld [vmem:[#allocation10 + $0x10] sm:$0xff] }
0x10db   :  { %v3748_v21 = vpop.eup %3747 }
0x10dc   :  { %1081 = vrot.lane.b32.xlu1 %v3748_v21, %s4009_s7  ;;  %v1336_v21 = vld [vmem:[%s4617_s10 + $0x18] sm:$0xff] }
0x10dd   :  { %v3750_v22 = vpop.eup %3749 }
0x10de   :  { %v1072_v24 = vadd.f32 1.0, %v3750_v22  ;;  %v1432_v22 = vld [vmem:[#allocation10 + $0x18] sm:$0xff] }
0x10e0   :  { %3751 = vrcp.f32 %v1072_v24  ;;  %v3587_v24 = vpack.c.bf16 %v1336_v21, %v1335_v20 }
0x10ea   :  { %v3752_v25 = vpop.eup %3751 }
0x10eb   :  { %v1079_v29 = vmul.f32 %v3752_v25, %v1077_v28 }
0x114e   :  { %v1082_v26 = vpop.permute.xlu1 %1081 }
0x114f   :  { %v1084_v27 = vmul.f32 %v3752_v25, %v1082_v26  ;;  %v3042_v26 = vld [vmem:[%s4608_s1 + $0x2] sm:$0x3] }
0x1151   :  { %1086 = vrot.lane.b32.xlu0 %v1084_v27, %s4010_s21 }
0x11c3   :  { %v1087_v31 = vpop.permute.xlu0 %1086 }
0x11c4   :  { %v1089_v32 = vadd.f32 %v1087_v31, %v1079_v29  ;;  %v3043_v31 = vld [vmem:[%s4609_s2 + $0x2] sm:$0x3] }
0x11c6   :  { %3753 = vtanh.f32 %v1089_v32  ;;  %v1192_v52 = vrot.slane %v1089_v32, 6 }
0x11d0   :  { %v3754_v33 = vpop.eup %3753 }
0x11d1   :  { %1092 = vrot.lane.b32.xlu1 %v3754_v33, %s4009_s7 }
0x1243   :  { %v1093_v34 = vpop.permute.xlu1 %1092 }
0x1244   :  { %v4330_v35 = vmul.f32 %v3752_v25, %v1093_v34  ;;  %v4374_v25 = vpack.c.bf16 %v1432_v22, %v1431_v23 }
0x1246   :  { %v1105_v36 = vrot.slane %v4330_v35, 2 }
0x1248   :  { %1106 = vrot.lane.b32.xlu0 %v1105_v36, %s4010_s21 }
0x12ba   :  { %v1107_v38 = vpop.permute.xlu0 %1106 }
0x12bb   :  { %3319 = vmatmul.mubr.msk.f32.vlgmr.msra.gmra.mrb[8].mxu1 %vm244_vm2, %v1107_v38 }
0x138e   :  { %v1176_v39 = vpop.f32.mrb[8].mxu1 }
0x138f   :  { %v1181_v41 = vrot.slane %v1176_v39, 4  ;;  %v3320_v43 = vpop.f32.mrb[9].mxu1  ;;  %v3039_v39 = vld [vmem:[#allocation11] ss:$0 sm:$0xff] }
0x1391   :  { %v1183_v44 = vadd.f32 %v1181_v41, %v4248_v40 }
0x1393   :  { %3755 = vtanh.f32 %v1183_v44  ;;  %v3036_v46 = vmul.f32 -1.442695, %v1183_v44 }
0x1395   :  { %3757 = vpow2.f32 %v3036_v46 }
0x139d   :  { %v3756_v45 = vpop.eup %3755 }
0x139e   :  { %1196 = vrot.lane.b32.xlu1 %v3756_v45, %s4009_s7 }
0x139f   :  { %v3758_v47 = vpop.eup %3757 }
0x13a0   :  { %v1187_v48 = vadd.f32 1.0, %v3758_v47 }
0x13a2   :  { %3759 = vrcp.f32 %v1187_v48 }
0x13ac   :  { %v3760_v49 = vpop.eup %3759 }
0x13ad   :  { %v1194_v53 = vmul.f32 %v3760_v49, %v1192_v52 }
0x1410   :  { %v1197_v50 = vpop.permute.xlu1 %1196 }
0x1411   :  { %v1199_v51 = vmul.f32 %v3760_v49, %v1197_v50 }
0x1413   :  { %1201 = vrot.lane.b32.xlu0 %v1199_v51, %s4010_s21 }
0x1485   :  { %v1202_v54 = vpop.permute.xlu0 %1201 }
0x1486   :  { %v1204_v55 = vadd.f32 %v1202_v54, %v1194_v53 }
0x1488   :  { %3761 = vtanh.f32 %v1204_v55 }
0x1492   :  { %v3762_v56 = vpop.eup %3761 }
0x1493   :  { %1207 = vrot.lane.b32.xlu1 %v3762_v56, %s4009_s7 }
0x1505   :  { %v1208_v42 = vpop.permute.xlu1 %1207 }
0x1506   :  { %v1210_v57 = vmul.f32 %v3760_v49, %v1208_v42 }
0x1508   :  { %v1220_v59 = vrot.slane %v1210_v57, 4 }
0x150a   :  { %1221 = vrot.lane.b32.xlu0 %v1220_v59, %s4010_s21  ;;  %v1536_v59 = vld [vmem:[%s4620_s13 + $0x8] sm:$0xff] }
0x157c   :  { %v1222_v60 = vpop.permute.xlu0 %1221 }
0x157d   :  { %3330 = vmatmul.mubr.msk.f32.vlgmr.msra.gmra.mrb[10].mxu0 %vm244_vm2, %v1222_v60  ;;  %v1537_v60 = vld [vmem:[%s4620_s13 + $0x10] sm:$0xff] }
0x157e   :  { %3351 = vmatprep.mubr.msk.f32.mxu0 %vm4007_vm3, %v4008_v30 }
0x1650   :  { %v1291_v61 = vpop.f32.mrb[10].mxu0 }
0x1651   :  { %v1296_v62 = vrot.slane %v1291_v61, 2  ;;  %v3331_v63 = vpop.f32.mrb[11].mxu0 }
0x1653   :  { %v1298_v0 = vadd.f32 %v1296_v62, %v4248_v40  ;;  %v1307_v40 = vrot.slane %v1204_v55, 6  ;;  %v1538_v62 = vld [vmem:[%s4620_s13 + $0x18] sm:$0xff] }
0x1654   :  { %v4424_v63 = vpack.c.bf16 %v1538_v62, %v1537_v60 }
0x1655   :  { %3763 = vtanh.f32 %v1298_v0  ;;  %v3038_v2 = vmul.f32 -1.442695, %v1298_v0 }
0x1657   :  { %3765 = vpow2.f32 %v3038_v2 }
0x165f   :  { %v3764_v1 = vpop.eup %3763 }
0x1660   :  { %1311 = vrot.lane.b32.xlu1 %v3764_v1, %s4009_s7 }
0x1661   :  { %v3766_v3 = vpop.eup %3765 }
0x1662   :  { %v1302_v4 = vadd.f32 1.0, %v3766_v3 }
0x1664   :  { %3767 = vrcp.f32 %v1302_v4  ;;  %v4445_v4 = vld [vmem:[#allocation13] ss:$0 sm:$0xff] }
0x166e   :  { %v3768_v5 = vpop.eup %3767 }
0x166f   :  { %v1309_v8 = vmul.f32 %v3768_v5, %v1307_v40 }
0x16d2   :  { %v1312_v6 = vpop.permute.xlu1 %1311 }
0x16d3   :  { %v1314_v7 = vmul.f32 %v3768_v5, %v1312_v6 }
0x16d5   :  { %1316 = vrot.lane.b32.xlu0 %v1314_v7, %s4010_s21 }
0x16d9   :  { %640 = vrot.lane.b32.xlu0 %v4273_v14, %s4010_s21 }
0x16dd   :  { %872 = vrot.lane.b32.xlu0 %v4303_v58, %s4010_s21  ;;  %v1333_v58 = vld [vmem:[%s4617_s10] sm:$0xff] }
0x16de   :  { %v3583_v17 = vpack.c.bf16 %v1334_v16, %v1333_v58 }
0x16e0   :  { %3584 = vmatprep.subr.bf16.mxu1 %v3583_v17 }
0x16e1   :  { %1212 = vrot.lane.b32.xlu0 %v1210_v57, %s4010_s21  ;;  %3586 = vmatpush3.bf16.msra.mxu1 %v3583_v17  ;;  %v1535_v57 = vld [vmem:[%s4620_s13] sm:$0xff] }
0x16e2   :  { %3588 = vmatprep.subr.bf16.mxu1 %v3587_v24  ;;  %v4418_v61 = vpack.c.bf16 %v1536_v59, %v1535_v57 }
0x16e5   :  { %3590 = vmatpush3.bf16.msra.mxu1 %v3587_v24 }
0x16e6   :  { %3597 = vmatprep.subr.bf16.mxu1 %v4006_v12 }
0x1747   :  { %v1317_v9 = vpop.permute.xlu0 %1316 }
0x1748   :  { %v1319_v10 = vadd.f32 %v1317_v9, %v1309_v8 }
0x174a   :  { %3769 = vtanh.f32 %v1319_v10 }
0x174b   :  { %v641_v11 = vpop.permute.xlu0 %640 }
0x174c   :  { %644 = vst.msk [vmem:[#allocation2] sm:$0xc] %vm643_vm5, %v641_v11 }
0x174f   :  { %v873_v13 = vpop.permute.xlu0 %872 }
0x1750   :  { %876 = vst.msk [vmem:[#allocation2] sm:$0xc0] %vm875_vm6, %v873_v13 }
0x1753   :  { %v1213_v14 = vpop.permute.xlu0 %1212 }
0x1754   :  { %v3770_v15 = vpop.eup %3769  ;;  %1215 = vst.msk [vmem:[#allocation2 + $0x8] sm:$0x30] %vm759_vm7, %v1213_v14 }
0x1755   :  { %1322 = vrot.lane.b32.xlu1 %v3770_v15, %s4009_s7 }
0x1759   :  { %756 = vrot.lane.b32.xlu1 %v4288_v37, %s4010_s21  ;;  %v4368_v37 = vpack.c.bf16 %v1430_v19, %v1429_v18 }
0x175b   :  { %3593 = vmatpush3.bf16.msra.mxu0 %v4368_v37 }
0x175c   :  { %3594 = vmatprep.subr.bf16.mxu0 %v4006_v12 }
0x175d   :  { %1097 = vrot.lane.b32.xlu1 %v4330_v35, %s4010_s21 }
0x175f   :  { %3596 = vmatpush3.bf16.msra.mxu0 %v4374_v25 }
0x1760   :  { %3603 = vmatprep.subr.bf16.mxu0 %v4006_v12 }
0x1762   :  { %3352 = vmatmul.mubr.msk.f32.vlgmr.msra.gmra.mrb[12].mxu0 %vm244_vm2, %v3042_v26 }
0x1763   :  { %3605 = vmatpush3.bf16.msra.mxu0 %v4368_v37  ;;  %3373 = vmatprep.mubr.msk.f32.mxu0 %vm4007_vm3, %v4008_v30 }
0x1764   :  { %3606 = vmatprep.subr.bf16.mxu0 %v4006_v12 }
0x1767   :  { %3608 = vmatpush3.bf16.msra.mxu0 %v4374_v25 }
0x1768   :  { %3615 = vmatprep.subr.bf16.mxu0 %v4006_v12 }
0x17c7   :  { %v1323_v27 = vpop.permute.xlu1 %1322 }
0x17c8   :  { %v1325_v28 = vmul.f32 %v3768_v5, %v1323_v27 }
0x17ca   :  { %1327 = vrot.lane.b32.xlu1 %v1325_v28, %s4010_s21 }
0x17cb   :  { %v757_v29 = vpop.permute.xlu1 %756 }
0x17cc   :  { %760 = vst.msk [vmem:[#allocation2] sm:$0x30] %vm759_vm7, %v757_v29 }
0x17ce   :  { %1515 = vrot.lane.b32.xlu1 %v3043_v31, %s4010_s21 }
0x17cf   :  { %v1098_v32 = vpop.permute.xlu1 %1097 }
0x17d0   :  { %1100 = vst.msk [vmem:[#allocation2 + $0x8] sm:$0xc] %vm643_vm5, %v1098_v32 }
0x17d3   :  { %v1331_v33 = vld [vmem:[#allocation2] sm:$0xff] }
0x17d4   :  { %3340 = vmatprep.mubr.msk.f32.mxu1 %vm244_vm2, %v1331_v33 }
0x1835   :  { %v1502_v36 = vpop.f32.mrb[12].mxu0 }
0x1836   :  { %v3353_v38 = vpop.f32.mrb[13].mxu0 }
0x183c   :  { %v1328_v34 = vpop.permute.xlu1 %1327 }
0x183d   :  { %1330 = vst.msk [vmem:[#allocation2 + $0x8] sm:$0xc0] %vm875_vm6, %v1328_v34 }
0x1840   :  { %v1516_v54 = vpop.permute.xlu1 %1515 }
0x1844   :  { %v1332_v35 = vld [vmem:[#allocation2 + $0x8] sm:$0xff] }
0x1845   :  { %3341 = vmatmul.mubr.msk.f32.vlgmr.msra.gmra.mrb[10].mxu1 %vm244_vm2, %v1332_v35 }
0x1846   :  { %3362 = vmatprep.mubr.msk.f32.mxu1 %vm4007_vm3, %v4008_v30  ;;  %3599 = vmatpush3.bf16.msra.mxu1 %v4418_v61 }
0x1847   :  { %3600 = vmatprep.subr.bf16.mxu1 %v4006_v12 }
0x184a   :  { %3602 = vmatpush3.bf16.msra.mxu1 %v4424_v63 }
0x184b   :  { %3609 = vmatprep.subr.bf16.mxu1 %v4006_v12 }
0x1918   :  { %v3342_v41 = vpop.f32.mrb[10].mxu1 }
0x1919   :  { %v4402_v43 = vadd.f32 %v3342_v41, %v3039_v39  ;;  %v1416_v44 = vpop.f32.mrb[11].mxu1 }
0x191a   :  { %v4404_v45 = vadd.f32 %v3039_v39, %v1416_v44 }
0x191c   :  { %v1506_v46 = vadd.f32 %v1502_v36, %v4404_v45 }
0x191e   :  { %3771 = vtanh.f32 %v1506_v46  ;;  %v3045_v48 = vmul.f32 -1.442695, %v1506_v46 }
0x1920   :  { %3773 = vpow2.f32 %v3045_v48 }
0x1928   :  { %v3772_v47 = vpop.eup %3771 }
0x1929   :  { %1520 = vrot.lane.b32.xlu0 %v3772_v47, %s4009_s7 }
0x192a   :  { %v3774_v49 = vpop.eup %3773 }
0x192b   :  { %v1510_v50 = vadd.f32 1.0, %v3774_v49 }
0x192d   :  { %3775 = vrcp.f32 %v1510_v50 }
0x1937   :  { %v3776_v51 = vpop.eup %3775 }
0x1938   :  { %v1518_v55 = vmul.f32 %v3776_v51, %v1516_v54 }
0x199b   :  { %v1521_v52 = vpop.permute.xlu0 %1520 }
0x199c   :  { %v1523_v53 = vmul.f32 %v3776_v51, %v1521_v52 }
0x199e   :  { %1525 = vrot.lane.b32.xlu0 %v1523_v53, %s4010_s21 }
0x1a10   :  { %v1526_v56 = vpop.permute.xlu0 %1525 }
0x1a11   :  { %v1528_v42 = vadd.f32 %v1526_v56, %v1518_v55 }
0x1a13   :  { %3777 = vtanh.f32 %v1528_v42  ;;  %v1709_v18 = vrot.slane %v1528_v42, 6 }
0x1a1d   :  { %v3778_v0 = vpop.eup %3777 }
0x1a1e   :  { %1531 = vrot.lane.b32.xlu1 %v3778_v0, %s4009_s7 }
0x1a90   :  { %v1532_v1 = vpop.permute.xlu1 %1531 }
0x1a91   :  { %v1534_v2 = vmul.f32 %v3776_v51, %v1532_v1 }
0x1a93   :  { %1547 = vrot.lane.b32.xlu0 %v1534_v2, %s4010_s21 }
0x1b05   :  { %v1548_v3 = vpop.permute.xlu0 %1547 }
0x1b06   :  { %3363 = vmatmul.mubr.msk.f32.vlgmr.msra.gmra.mrb[12].mxu1 %vm244_vm2, %v1548_v3  ;;  %3374 = vmatmul.mubr.msk.f32.vlgmr.msra.gmra.mrb[14].mxu0 %vm244_vm2, %v1548_v3 }
0x1b07   :  { %3611 = vmatpush3.bf16.msra.mxu1 %v4418_v61  ;;  %3617 = vmatpush3.bf16.msra.mxu0 %v4368_v37 }
0x1b08   :  { %3612 = vmatprep.subr.bf16.mxu1 %v4006_v12  ;;  %3618 = vmatprep.subr.bf16.mxu0 %v4006_v12 }
0x1b09   :  { %3395 = vmatprep.mubr.msk.f32.mxu0 %vm4007_vm3, %v4008_v30  ;;  %3384 = vmatprep.mubr.msk.f32.mxu1 %vm4007_vm3, %v4008_v30 }
0x1b0b   :  { %3614 = vmatpush3.bf16.msra.mxu1 %v4424_v63  ;;  %3620 = vmatpush3.bf16.msra.mxu0 %v4374_v25 }
0x1b0c   :  { %3621 = vmatprep.subr.bf16.mxu1 %v4006_v12  ;;  %3627 = vmatprep.subr.bf16.mxu0 %v4006_v12 }
0x1bd9   :  { %v1617_v5 = vpop.f32.mrb[12].mxu1  ;;  %v1693_v6 = vpop.f32.mrb[14].mxu0 }
0x1bda   :  { %v1618_v7 = vadd.f32 %v4445_v4, %v1617_v5  ;;  %v1698_v40 = vrot.slane %v1693_v6, 6  ;;  %v3364_v8 = vpop.f32.mrb[13].mxu1  ;;  %v3375_v9 = vpop.f32.mrb[15].mxu0 }
0x1bdc   :  { %1622 = vst.msk [vmem:[%s4622_s15] sm:$0x3] %vm1621_vm8, %v1618_v7  ;;  %v1700_v10 = vadd.f32 %v1698_v40, %v4404_v45 }
0x1bde   :  { %3779 = vtanh.f32 %v1700_v10  ;;  %v3049_v13 = vmul.f32 -1.442695, %v1700_v10 }
0x1be0   :  { %3781 = vpow2.f32 %v3049_v13 }
0x1be8   :  { %v3780_v11 = vpop.eup %3779 }
0x1be9   :  { %1713 = vrot.lane.b32.xlu1 %v3780_v11, %s4009_s7 }
0x1bea   :  { %v3782_v14 = vpop.eup %3781 }
0x1beb   :  { %v1704_v15 = vadd.f32 1.0, %v3782_v14 }
0x1bed   :  { %3783 = vrcp.f32 %v1704_v15 }
0x1bf7   :  { %v3784_v58 = vpop.eup %3783 }
0x1bf8   :  { %v1711_v19 = vmul.f32 %v3784_v58, %v1709_v18 }
0x1c5b   :  { %v1714_v16 = vpop.permute.xlu1 %1713 }
0x1c5c   :  { %v1716_v17 = vmul.f32 %v3784_v58, %v1714_v16 }
0x1c5e   :  { %1718 = vrot.lane.b32.xlu0 %v1716_v17, %s4010_s21 }
0x1cd0   :  { %v1719_v20 = vpop.permute.xlu0 %1718 }
0x1cd1   :  { %v1721_v21 = vadd.f32 %v1719_v20, %v1711_v19 }
0x1cd3   :  { %3785 = vtanh.f32 %v1721_v21  ;;  %v1907_v47 = vrot.slane %v1721_v21, 6 }
0x1cdd   :  { %v3786_v23 = vpop.eup %3785 }
0x1cde   :  { %1724 = vrot.lane.b32.xlu1 %v3786_v23, %s4009_s7 }
0x1d50   :  { %v1725_v22 = vpop.permute.xlu1 %1724 }
0x1d51   :  { %v1727_v24 = vmul.f32 %v3784_v58, %v1725_v22 }
0x1d53   :  { %v1740_v26 = vrot.slane %v1727_v24, 2 }
0x1d55   :  { %1741 = vrot.lane.b32.xlu0 %v1740_v26, %s4010_s21 }
0x1dc7   :  { %v1742_v27 = vpop.permute.xlu0 %1741 }
0x1dc8   :  { %3385 = vmatmul.mubr.msk.f32.vlgmr.msra.gmra.mrb[14].mxu1 %vm244_vm2, %v1742_v27  ;;  %3396 = vmatmul.mubr.msk.f32.vlgmr.msra.gmra.mrb[16].mxu0 %vm244_vm2, %v1742_v27 }
0x1dc9   :  { %3623 = vmatpush3.bf16.msra.mxu1 %v4418_v61  ;;  %3629 = vmatpush3.bf16.msra.mxu0 %v4368_v37 }
0x1dca   :  { %3624 = vmatprep.subr.bf16.mxu1 %v4006_v12  ;;  %3630 = vmatprep.subr.bf16.mxu0 %v4006_v12 }
0x1dcb   :  { %3417 = vmatprep.mubr.msk.f32.mxu0 %vm4007_vm3, %v4008_v30  ;;  %3406 = vmatprep.mubr.msk.f32.mxu1 %vm4007_vm3, %v4008_v30 }
0x1dcd   :  { %3626 = vmatpush3.bf16.msra.mxu1 %v4424_v63  ;;  %3632 = vmatpush3.bf16.msra.mxu0 %v4374_v25 }
0x1dce   :  { %3633 = vmatprep.subr.bf16.mxu1 %v4006_v12  ;;  %3639 = vmatprep.subr.bf16.mxu0 %v4006_v12 }
0x1e9b   :  { %v4470_v28 = vpop.f32.mrb[14].mxu1  ;;  %v1891_v29 = vpop.f32.mrb[16].mxu0 }
0x1e9c   :  { %v1896_v31 = vrot.slane %v1891_v29, 4  ;;  %v3386_v32 = vpop.f32.mrb[15].mxu1  ;;  %v3397_v33 = vpop.f32.mrb[17].mxu0 }
0x1e9e   :  { %v1898_v34 = vadd.f32 %v1896_v31, %v4404_v45 }
0x1ea0   :  { %3787 = vtanh.f32 %v1898_v34  ;;  %v3053_v36 = vmul.f32 -1.442695, %v1898_v34 }
0x1ea2   :  { %3789 = vpow2.f32 %v3053_v36 }
0x1eaa   :  { %v3788_v35 = vpop.eup %3787 }
0x1eab   :  { %1911 = vrot.lane.b32.xlu1 %v3788_v35, %s4009_s7 }
0x1eac   :  { %v3790_v38 = vpop.eup %3789 }
0x1ead   :  { %v1902_v39 = vadd.f32 1.0, %v3790_v38 }
0x1eaf   :  { %3791 = vrcp.f32 %v1902_v39 }
0x1eb9   :  { %v3792_v41 = vpop.eup %3791 }
0x1eba   :  { %v1909_v48 = vmul.f32 %v3792_v41, %v1907_v47 }
0x1f1d   :  { %v1912_v44 = vpop.permute.xlu1 %1911 }
0x1f1e   :  { %v1914_v46 = vmul.f32 %v3792_v41, %v1912_v44 }
0x1f20   :  { %1916 = vrot.lane.b32.xlu0 %v1914_v46, %s4010_s21 }
0x1f92   :  { %v1917_v49 = vpop.permute.xlu0 %1916 }
0x1f93   :  { %v1919_v50 = vadd.f32 %v1917_v49, %v1909_v48 }
0x1f95   :  { %3793 = vtanh.f32 %v1919_v50  ;;  %v2105_v40 = vrot.slane %v1919_v50, 6 }
0x1f9f   :  { %v3794_v51 = vpop.eup %3793 }
0x1fa0   :  { %1922 = vrot.lane.b32.xlu1 %v3794_v51, %s4009_s7 }
0x2012   :  { %v1923_v52 = vpop.permute.xlu1 %1922 }
0x2013   :  { %v1925_v53 = vmul.f32 %v3792_v41, %v1923_v52 }
0x2015   :  { %v1938_v54 = vrot.slane %v1925_v53, 4 }
0x2017   :  { %1939 = vrot.lane.b32.xlu0 %v1938_v54, %s4010_s21 }
0x2089   :  { %v1940_v55 = vpop.permute.xlu0 %1939 }
0x208a   :  { %3407 = vmatmul.mubr.msk.f32.vlgmr.msra.gmra.mrb[16].mxu1 %vm244_vm2, %v1940_v55  ;;  %3418 = vmatmul.mubr.msk.f32.vlgmr.msra.gmra.mrb[18].mxu0 %vm244_vm2, %v1940_v55 }
0x208b   :  { %3635 = vmatpush3.bf16.msra.mxu1 %v4418_v61  ;;  %3641 = vmatpush3.bf16.msra.mxu0 %v4368_v37 }
0x208c   :  { %3636 = vmatprep.subr.bf16.mxu1 %v4006_v12  ;;  %3642 = vmatprep.subr.bf16.mxu0 %v4006_v12 }
0x208d   :  { %3439 = vmatprep.mubr.msk.f32.mxu0 %vm4007_vm3, %v4008_v30  ;;  %3428 = vmatprep.mubr.msk.f32.mxu1 %vm4007_vm3, %v4008_v30 }
0x208f   :  { %3638 = vmatpush3.bf16.msra.mxu1 %v4424_v63  ;;  %3644 = vmatpush3.bf16.msra.mxu0 %v4374_v25 }
0x2090   :  { %3645 = vmatprep.subr.bf16.mxu1 %v4006_v12  ;;  %3651 = vmatprep.subr.bf16.mxu0 %v4006_v12 }
0x215d   :  { %v4491_v56 = vpop.f32.mrb[16].mxu1  ;;  %v2089_v42 = vpop.f32.mrb[18].mxu0 }
0x215e   :  { %v2094_v57 = vrot.slane %v2089_v42, 2  ;;  %v3408_v59 = vpop.f32.mrb[17].mxu1  ;;  %v3419_v60 = vpop.f32.mrb[19].mxu0 }
0x2160   :  { %v2096_v62 = vadd.f32 %v2094_v57, %v4404_v45 }
0x2162   :  { %3795 = vtanh.f32 %v2096_v62  ;;  %v3057_v1 = vmul.f32 -1.442695, %v2096_v62 }
0x2164   :  { %3797 = vpow2.f32 %v3057_v1 }
0x216c   :  { %v3796_v0 = vpop.eup %3795 }
0x216d   :  { %2109 = vrot.lane.b32.xlu1 %v3796_v0, %s4009_s7 }
0x216e   :  { %v3798_v2 = vpop.eup %3797 }
0x216f   :  { %v2100_v3 = vadd.f32 1.0, %v3798_v2 }
0x2171   :  { %3799 = vrcp.f32 %v2100_v3 }
0x217b   :  { %v3800_v5 = vpop.eup %3799 }
0x217c   :  { %v2107_v8 = vmul.f32 %v3800_v5, %v2105_v40 }
0x21df   :  { %v2110_v6 = vpop.permute.xlu1 %2109 }
0x21e0   :  { %v2112_v7 = vmul.f32 %v3800_v5, %v2110_v6 }
0x21e2   :  { %2114 = vrot.lane.b32.xlu0 %v2112_v7, %s4010_s21 }
0x2254   :  { %v2115_v9 = vpop.permute.xlu0 %2114 }
0x2255   :  { %v2117_v10 = vadd.f32 %v2115_v9, %v2107_v8 }
0x2257   :  { %3801 = vtanh.f32 %v2117_v10  ;;  %v2300_v29 = vrot.slane %v2117_v10, 6 }
0x2261   :  { %v3802_v45 = vpop.eup %3801 }
0x2262   :  { %2120 = vrot.lane.b32.xlu1 %v3802_v45, %s4009_s7 }
0x22d4   :  { %v2121_v11 = vpop.permute.xlu1 %2120 }
0x22d5   :  { %v2123_v13 = vmul.f32 %v3800_v5, %v2121_v11 }
0x22d7   :  { %v2136_v14 = vrot.slane %v2123_v13, 6 }
0x22d9   :  { %2137 = vrot.lane.b32.xlu0 %v2136_v14, %s4010_s21 }
0x234b   :  { %v2138_v15 = vpop.permute.xlu0 %2137 }
0x234c   :  { %3429 = vmatmul.mubr.msk.f32.vlgmr.msra.gmra.mrb[18].mxu1 %vm244_vm2, %v2138_v15  ;;  %3440 = vmatmul.mubr.msk.f32.vlgmr.msra.gmra.mrb[20].mxu0 %vm244_vm2, %v2138_v15 }
0x234d   :  { %3647 = vmatpush3.bf16.msra.mxu1 %v4418_v61  ;;  %3653 = vmatpush3.bf16.msra.mxu0 %v4368_v37 }
0x234e   :  { %3648 = vmatprep.subr.bf16.mxu1 %v4006_v12  ;;  %3654 = vmatprep.subr.bf16.mxu0 %v4006_v12 }
0x234f   :  { %3461 = vmatprep.mubr.msk.f32.mxu0 %vm4007_vm3, %v4008_v30  ;;  %3450 = vmatprep.mubr.msk.f32.mxu1 %vm4007_vm3, %v4008_v30 }
0x2351   :  { %3650 = vmatpush3.bf16.msra.mxu1 %v4424_v63  ;;  %3656 = vmatpush3.bf16.msra.mxu0 %v4374_v25 }
0x2352   :  { %3657 = vmatprep.subr.bf16.mxu1 %v4006_v12  ;;  %3663 = vmatprep.subr.bf16.mxu0 %v4006_v12 }
0x241f   :  { %v4512_v58 = vpop.f32.mrb[18].mxu1  ;;  %v2287_v16 = vpop.f32.mrb[20].mxu0 }
0x2420   :  { %v2291_v17 = vadd.f32 %v2287_v16, %v4402_v43  ;;  %v3430_v18 = vpop.f32.mrb[19].mxu1  ;;  %v3441_v19 = vpop.f32.mrb[21].mxu0 }
0x2422   :  { %3803 = vtanh.f32 %v2291_v17  ;;  %v3061_v21 = vmul.f32 -1.442695, %v2291_v17 }
0x2424   :  { %3805 = vpow2.f32 %v3061_v21 }
0x242c   :  { %v3804_v20 = vpop.eup %3803 }
0x242d   :  { %2304 = vrot.lane.b32.xlu1 %v3804_v20, %s4009_s7 }
0x242e   :  { %v3806_v23 = vpop.eup %3805 }
0x242f   :  { %v2295_v22 = vadd.f32 1.0, %v3806_v23 }
0x2431   :  { %3807 = vrcp.f32 %v2295_v22 }
0x243b   :  { %v3808_v24 = vpop.eup %3807 }
0x243c   :  { %v2302_v31 = vmul.f32 %v3808_v24, %v2300_v29 }
0x249f   :  { %v2305_v26 = vpop.permute.xlu1 %2304 }
0x24a0   :  { %v2307_v27 = vmul.f32 %v3808_v24, %v2305_v26 }
0x24a2   :  { %2309 = vrot.lane.b32.xlu0 %v2307_v27, %s4010_s21 }
0x2514   :  { %v2310_v32 = vpop.permute.xlu0 %2309 }
0x2515   :  { %v2312_v33 = vadd.f32 %v2310_v32, %v2302_v31 }
0x2517   :  { %3809 = vtanh.f32 %v2312_v33  ;;  %v2497_v42 = vrot.slane %v2312_v33, 6 }
0x2521   :  { %v3810_v34 = vpop.eup %3809 }
0x2522   :  { %2315 = vrot.lane.b32.xlu1 %v3810_v34, %s4009_s7 }
0x2594   :  { %v2316_v35 = vpop.permute.xlu1 %2315 }
0x2595   :  { %v2318_v36 = vmul.f32 %v3808_v24, %v2316_v35 }
0x2597   :  { %2331 = vrot.lane.b32.xlu0 %v2318_v36, %s4010_s21 }
0x2609   :  { %v2332_v38 = vpop.permute.xlu0 %2331 }
0x260a   :  { %3451 = vmatmul.mubr.msk.f32.vlgmr.msra.gmra.mrb[20].mxu1 %vm244_vm2, %v2332_v38  ;;  %3462 = vmatmul.mubr.msk.f32.vlgmr.msra.gmra.mrb[22].mxu0 %vm244_vm2, %v2332_v38 }
0x260b   :  { %3659 = vmatpush3.bf16.msra.mxu1 %v4418_v61  ;;  %3665 = vmatpush3.bf16.msra.mxu0 %v4368_v37 }
0x260c   :  { %3660 = vmatprep.subr.bf16.mxu1 %v4006_v12  ;;  %3666 = vmatprep.subr.bf16.mxu0 %v4006_v12 }
0x260d   :  { %3483 = vmatprep.mubr.msk.f32.mxu0 %vm4007_vm3, %v4008_v30  ;;  %3472 = vmatprep.mubr.msk.f32.mxu1 %vm4007_vm3, %v4008_v30 }
0x260f   :  { %3662 = vmatpush3.bf16.msra.mxu1 %v4424_v63  ;;  %3668 = vmatpush3.bf16.msra.mxu0 %v4374_v25 }
0x2610   :  { %3669 = vmatprep.subr.bf16.mxu1 %v4006_v12  ;;  %3675 = vmatprep.subr.bf16.mxu0 %v4006_v12 }
0x26dd   :  { %v4533_v39 = vpop.f32.mrb[20].mxu1  ;;  %v2481_v41 = vpop.f32.mrb[22].mxu0 }
0x26de   :  { %v2486_v44 = vrot.slane %v2481_v41, 6  ;;  %v3452_v46 = vpop.f32.mrb[21].mxu1  ;;  %v3463_v47 = vpop.f32.mrb[23].mxu0 }
0x26df   :  { %v1812_v46 = vadd.f32 %v4445_v4, %v4470_v28  ;;  %v2208_v47 = vadd.f32 %v4445_v4, %v4512_v58  ;;  %v2010_v28 = vadd.f32 %v4445_v4, %v4491_v56  ;;  %v2402_v58 = vadd.f32 %v4445_v4, %v4533_v39 }
0x26e0   :  { %v2488_v48 = vadd.f32 %v2486_v44, %v4402_v43 }
0x26e2   :  { %3811 = vtanh.f32 %v2488_v48  ;;  %v3065_v50 = vmul.f32 -1.442695, %v2488_v48 }
0x26e4   :  { %3813 = vpow2.f32 %v3065_v50 }
0x26ec   :  { %v3812_v49 = vpop.eup %3811 }
0x26ed   :  { %2501 = vrot.lane.b32.xlu1 %v3812_v49, %s4009_s7 }
0x26ee   :  { %v3814_v51 = vpop.eup %3813 }
0x26ef   :  { %v2492_v52 = vadd.f32 1.0, %v3814_v51 }
0x26f1   :  { %3815 = vrcp.f32 %v2492_v52 }
0x26fb   :  { %v3816_v53 = vpop.eup %3815 }
0x26fc   :  { %v2499_v57 = vmul.f32 %v3816_v53, %v2497_v42 }
0x275f   :  { %v2502_v54 = vpop.permute.xlu1 %2501 }
0x2760   :  { %v2504_v55 = vmul.f32 %v3816_v53, %v2502_v54 }
0x2762   :  { %2506 = vrot.lane.b32.xlu0 %v2504_v55, %s4010_s21 }
0x27d4   :  { %v2507_v59 = vpop.permute.xlu0 %2506 }
0x27d5   :  { %v2509_v60 = vadd.f32 %v2507_v59, %v2499_v57 }
0x27d7   :  { %3817 = vtanh.f32 %v2509_v60  ;;  %v2695_v15 = vrot.slane %v2509_v60, 6 }
0x27e1   :  { %v3818_v62 = vpop.eup %3817 }
0x27e2   :  { %2512 = vrot.lane.b32.xlu1 %v3818_v62, %s4009_s7 }
0x2854   :  { %v2513_v0 = vpop.permute.xlu1 %2512 }
0x2855   :  { %v2515_v1 = vmul.f32 %v3816_v53, %v2513_v0 }
0x2857   :  { %v2528_v2 = vrot.slane %v2515_v1, 2 }
0x2859   :  { %2529 = vrot.lane.b32.xlu0 %v2528_v2, %s4010_s21 }
0x28cb   :  { %v2530_v3 = vpop.permute.xlu0 %2529 }
0x28cc   :  { %3473 = vmatmul.mubr.msk.f32.vlgmr.msra.gmra.mrb[22].mxu1 %vm244_vm2, %v2530_v3  ;;  %3484 = vmatmul.mubr.msk.f32.vlgmr.msra.gmra.mrb[24].mxu0 %vm244_vm2, %v2530_v3 }
0x28cd   :  { %3671 = vmatpush3.bf16.msra.mxu1 %v4418_v61  ;;  %3677 = vmatpush3.bf16.msra.mxu0 %v4368_v37 }
0x28ce   :  { %3672 = vmatprep.subr.bf16.mxu1 %v4006_v12  ;;  %3678 = vmatprep.subr.bf16.mxu0 %v4006_v12 }
0x28cf   :  { %3505 = vmatprep.mubr.msk.f32.mxu0 %vm4007_vm3, %v4008_v30  ;;  %3494 = vmatprep.mubr.msk.f32.mxu1 %vm4007_vm3, %v4008_v30 }
0x28d1   :  { %3674 = vmatpush3.bf16.msra.mxu1 %v4424_v63  ;;  %3680 = vmatpush3.bf16.msra.mxu0 %v4374_v25 }
0x28d2   :  { %3681 = vmatprep.subr.bf16.mxu1 %v4006_v12 }
0x299f   :  { %v4553_v5 = vpop.f32.mrb[22].mxu1  ;;  %v2679_v6 = vpop.f32.mrb[24].mxu0 }
0x29a0   :  { %v2684_v37 = vrot.slane %v2679_v6, 4  ;;  %v3474_v7 = vpop.f32.mrb[23].mxu1  ;;  %v3485_v40 = vpop.f32.mrb[25].mxu0  ;;  %v2600_v48 = vadd.f32 %v4445_v4, %v4553_v5 }
0x29a2   :  { %v2686_v8 = vadd.f32 %v2684_v37, %v4402_v43 }
0x29a4   :  { %3819 = vtanh.f32 %v2686_v8  ;;  %v3069_v10 = vmul.f32 -1.442695, %v2686_v8 }
0x29a6   :  { %3821 = vpow2.f32 %v3069_v10 }
0x29ae   :  { %v3820_v9 = vpop.eup %3819 }
0x29af   :  { %2699 = vrot.lane.b32.xlu1 %v3820_v9, %s4009_s7 }
0x29b0   :  { %v3822_v45 = vpop.eup %3821 }
0x29b1   :  { %v2690_v11 = vadd.f32 1.0, %v3822_v45 }
0x29b3   :  { %3823 = vrcp.f32 %v2690_v11 }
0x29bd   :  { %v3824_v25 = vpop.eup %3823 }
0x29be   :  { %v2697_v16 = vmul.f32 %v3824_v25, %v2695_v15 }
0x2a21   :  { %v2700_v13 = vpop.permute.xlu1 %2699 }
0x2a22   :  { %v2702_v14 = vmul.f32 %v3824_v25, %v2700_v13 }
0x2a24   :  { %2704 = vrot.lane.b32.xlu0 %v2702_v14, %s4010_s21 }
0x2a96   :  { %v2705_v17 = vpop.permute.xlu0 %2704 }
0x2a97   :  { %v2707_v18 = vadd.f32 %v2705_v17, %v2697_v16 }
0x2a99   :  { %3825 = vtanh.f32 %v2707_v18 }
0x2aa3   :  { %v3826_v19 = vpop.eup %3825 }
0x2aa4   :  { %2710 = vrot.lane.b32.xlu1 %v3826_v19, %s4009_s7 }
0x2b16   :  { %v2711_v20 = vpop.permute.xlu1 %2710 }
0x2b17   :  { %v2713_v21 = vmul.f32 %v3824_v25, %v2711_v20 }
0x2b19   :  { %v2726_v23 = vrot.slane %v2713_v21, 4 }
0x2b1b   :  { %2727 = vrot.lane.b32.xlu0 %v2726_v23, %s4010_s21 }
0x2b8d   :  { %v2728_v22 = vpop.permute.xlu0 %2727 }
0x2b8e   :  { %3495 = vmatmul.mubr.msk.f32.vlgmr.msra.gmra.mrb[24].mxu1 %vm244_vm2, %v2728_v22  ;;  %3506 = vmatmul.mubr.msk.f32.vlgmr.msra.gmra.mrb[26].mxu0 %vm244_vm2, %v2728_v22 }
0x2b8f   :  { %3683 = vmatpush3.bf16.msra.mxu1 %v4418_v61  ;;  %3516 = vmatprep.mubr.msk.f32.mxu1 %vm4007_vm3, %v4008_v30 }
0x2b90   :  { %3684 = vmatprep.subr.bf16.mxu1 %v4006_v12 }
0x2b93   :  { %3686 = vmatpush3.bf16.msra.mxu1 %v4424_v63  ;;  %v2893_v63 = vrot.slane %v2707_v18, 6 }
0x2c61   :  { %v2797_v24 = vpop.f32.mrb[24].mxu1  ;;  %v2877_v26 = vpop.f32.mrb[26].mxu0 }
0x2c62   :  { %v2882_v27 = vrot.slane %v2877_v26, 2  ;;  %v3496_v29 = vpop.f32.mrb[25].mxu1  ;;  %v3507_v31 = vpop.f32.mrb[27].mxu0  ;;  %v2798_v53 = vadd.f32 %v4445_v4, %v2797_v24 }
0x2c64   :  { %v2884_v32 = vadd.f32 %v2882_v27, %v4402_v43 }
0x2c66   :  { %3827 = vtanh.f32 %v2884_v32  ;;  %v3073_v34 = vmul.f32 -1.442695, %v2884_v32 }
0x2c68   :  { %3829 = vpow2.f32 %v3073_v34 }
0x2c70   :  { %v3828_v33 = vpop.eup %3827 }
0x2c71   :  { %2897 = vrot.lane.b32.xlu1 %v3828_v33, %s4009_s7 }
0x2c72   :  { %v3830_v61 = vpop.eup %3829 }
0x2c73   :  { %v2888_v35 = vadd.f32 1.0, %v3830_v61 }
0x2c75   :  { %3831 = vrcp.f32 %v2888_v35 }
0x2c7f   :  { %v3832_v30 = vpop.eup %3831 }
0x2c80   :  { %v2895_v38 = vmul.f32 %v3832_v30, %v2893_v63 }
0x2ce3   :  { %v2898_v12 = vpop.permute.xlu1 %2897 }
0x2ce4   :  { %v2900_v36 = vmul.f32 %v3832_v30, %v2898_v12 }
0x2ce6   :  { %2902 = vrot.lane.b32.xlu0 %v2900_v36, %s4010_s21 }
0x2d58   :  { %v2903_v41 = vpop.permute.xlu0 %2902 }
0x2d59   :  { %v2905_v44 = vadd.f32 %v2903_v41, %v2895_v38 }
0x2d5b   :  { %3833 = vtanh.f32 %v2905_v44 }
0x2d65   :  { %v3834_v43 = vpop.eup %3833 }
0x2d66   :  { %2908 = vrot.lane.b32.xlu1 %v3834_v43, %s4009_s7 }
0x2d6a   :  { %1816 = vrot.lane.b32.xlu1 %v1812_v46, %s4011_s26 }
0x2d6e   :  { %2212 = vrot.lane.b32.xlu1 %v2208_v47, %s4012_s11 }
0x2d72   :  { %2604 = vrot.lane.b32.xlu1 %v2600_v48, %s4013_s3 }
0x2dd8   :  { %v2909_v49 = vpop.permute.xlu1 %2908 }
0x2dd9   :  { %v2911_v50 = vmul.f32 %v3832_v30, %v2909_v49 }
0x2ddb   :  { %v2924_v51 = vrot.slane %v2911_v50, 6 }
0x2ddc   :  { %v1817_v52 = vpop.permute.xlu1 %1816 }
0x2ddd   :  { %1820 = vst.msk [vmem:[%s4622_s15] sm:$0x3] %vm1819_vm9, %v1817_v52  ;;  %2925 = vrot.lane.b32.xlu0 %v2924_v51, %s4010_s21 }
0x2de0   :  { %v2213_v55 = vpop.permute.xlu1 %2212 }
0x2de1   :  { %2014 = vrot.lane.b32.xlu0 %v2010_v28, %s4003_s17 }
0x2de4   :  { %v2605_v39 = vpop.permute.xlu1 %2604 }
0x2de5   :  { %2406 = vrot.lane.b32.xlu0 %v2402_v58, %s4014_s9 }
0x2de9   :  { %2802 = vrot.lane.b32.xlu0 %v2798_v53, %s4015_s27 }
0x2e4f   :  { %v2926_v54 = vpop.permute.xlu0 %2925 }
0x2e50   :  { %3517 = vmatmul.mubr.msk.f32.vlgmr.msra.gmra.mrb[26].mxu1 %vm244_vm2, %v2926_v54 }
0x2e53   :  { %v2015_v42 = vpop.permute.xlu0 %2014 }
0x2e54   :  { %2018 = vst.msk [vmem:[%s4622_s15] sm:$0x3] %vm2017_vm10, %v2015_v42 }
0x2e55   :  { %2216 = vst.msk [vmem:[%s4622_s15] sm:$0x3] %vm2215_vm11, %v2213_v55 }
0x2e57   :  { %v2407_v56 = vpop.permute.xlu0 %2406 }
0x2e58   :  { %2410 = vst.msk [vmem:[%s4622_s15] sm:$0x3] %vm2409_vm12, %v2407_v56 }
0x2e59   :  { %2608 = vst.msk [vmem:[%s4622_s15] sm:$0x3] %vm2607_vm13, %v2605_v39 }
0x2e5b   :  { %v2803_v57 = vpop.permute.xlu0 %2802 }
0x2e5c   :  { %2806 = vst.msk [vmem:[%s4622_s15] sm:$0x3] %vm2805_vm14, %v2803_v57 }
0x2f23   :  { %v2995_v59 = vpop.f32.mrb[26].mxu1 }
0x2f24   :  { %v2996_v60 = vadd.f32 %v4445_v4, %v2995_v59  ;;  %v3518_v62 = vpop.f32.mrb[27].mxu1 }
0x2f26   :  { %3000 = vrot.lane.b32.xlu1 %v2996_v60, %s4016_s29 }
0x2f98   :  { %v3001_v0 = vpop.permute.xlu1 %3000 }
0x2f99   :  { %3004 = vst.msk [vmem:[%s4622_s15] sm:$0x3] %vm3003_vm15, %v3001_v0 }
0x2f9a   :  { %3009 = vsyncpa [#allocation4], 1 }
0x2f9b   :  { %3010 = vsyncpa [#allocation6], 1 }
0x2f9c   :  { %3011 = vsyncpa [#allocation9], 1 }
0x2f9d   :  { %3012 = vsyncpa [#allocation12], 1 }

</bundles_post_ra>
